<compile_context>
chip_gen: v7x
topology: tpu7x:2x2x1
jax: 0.10.0
libtpu: 0.0.40
codegen_flags: <defaults>
</compile_context>

<pallas_src>
import jax
import jax.numpy as jnp
from jax.experimental import pallas as pl
from jax.experimental.pallas import tpu as pltpu


D_IN = 784
D_OUT_PAD = 128      # padded final width (real logits live in [:, :10])
N_CLASSES = 10

# Layer shapes after padding the narrow tail layers (64, 10) to 128 lanes.
_W_SHAPES = [(784, 512), (512, 256), (256, 128), (128, 128), (128, 128)]
_B_SHAPES = [(1, 512), (1, 256), (1, 128), (1, 128), (1, 128)]

_FLOPS_PER_ROW = 2 * sum(i * o for i, o in _W_SHAPES)          # 2 * 598016
_PARAM_BYTES = (sum(i * o for i, o in _W_SHAPES) * 2            # bf16 weights
                + sum(o for _, o in _B_SHAPES) * 4)             # f32 biases


def mlp_kernel(x_ref,
               w1_ref, b1_ref,
               w2_ref, b2_ref,
               w3_ref, b3_ref,
               w4_ref, b4_ref,
               w5_ref, b5_ref,
               out_ref):
    """Fused 5-layer MLP forward for one (TILE_B, 784) bf16 batch tile.

    Matmul operands are bf16 (MXU-native) with f32 accumulation; bias-add
    and ReLU run in f32 on the VPU (important on v5e: no bf16 VALUs).
    """
    h = x_ref[...]                                                      # bf16 (B, 784)

    h = jnp.dot(h, w1_ref[...], preferred_element_type=jnp.float32)    # (B, 512)
    h = jnp.maximum(h + b1_ref[...], 0.0).astype(jnp.bfloat16)

    h = jnp.dot(h, w2_ref[...], preferred_element_type=jnp.float32)    # (B, 256)
    h = jnp.maximum(h + b2_ref[...], 0.0).astype(jnp.bfloat16)

    h = jnp.dot(h, w3_ref[...], preferred_element_type=jnp.float32)    # (B, 128)
    h = jnp.maximum(h + b3_ref[...], 0.0).astype(jnp.bfloat16)

    h = jnp.dot(h, w4_ref[...], preferred_element_type=jnp.float32)    # (B, 128) padded from 64
    h = jnp.maximum(h + b4_ref[...], 0.0).astype(jnp.bfloat16)

    h = jnp.dot(h, w5_ref[...], preferred_element_type=jnp.float32)    # (B, 128) padded from 10
    out_ref[...] = h + b5_ref[...]                                      # no ReLU on last layer


def _round_up(x, m):
    return (x + m - 1) // m * m


def prepare_params(params_f32):
    """Cast weights to bf16 and zero-pad the narrow tail layers to 128 lanes.

    Input: list of (W, b) with W shaped (in, out) f32, b shaped (1, out) f32
    (PyTorch Linear weights transposed).  Output: flat tuple
    (w1, b1, ..., w5, b5) where layer-4/5 outputs are padded to 128 features.
    Zero padding is mathematically inert: padded h4 columns are relu(0+0)=0,
    and padded logit columns are 0 and sliced off.
    """
    (w1, b1), (w2, b2), (w3, b3), (w4, b4), (w5, b5) = params_f32

    w4p = jnp.zeros((128, 128), jnp.float32).at[:, :64].set(w4)
    b4p = jnp.zeros((1, 128), jnp.float32).at[:, :64].set(b4)
    w5p = jnp.zeros((128, 128), jnp.float32).at[:64, :10].set(w5)
    b5p = jnp.zeros((1, 128), jnp.float32).at[:, :10].set(b5)

    ws = [w1, w2, w3, w4p, w5p]
    bs = [b1, b2, b3, b4p, b5p]
    flat = []
    for w, b in zip(ws, bs):
        flat.append(w.astype(jnp.bfloat16))   # MXU operands in bf16
        flat.append(b.astype(jnp.float32))    # bias-add stays f32
    return tuple(flat)


def net_forward(x, flat_params, *, tile_b=512):
    """x: any shape whose trailing elements total a multiple of 784 (NCHW ok)."""
    # Cast to bf16 once at the boundary: halves the dominant input DMA stream
    # and removes the in-kernel f32->bf16 repack.
    x2d = x.reshape(-1, D_IN).astype(jnp.bfloat16)      # == x.view(-1, 784)
    batch = x2d.shape[0]

    # bf16 sublane packing: tile rows / padded batch must be multiples of 16.
    tile_b = _round_up(min(tile_b, _round_up(batch, 16)), 16)
    padded = _round_up(batch, tile_b)
    # Give v7x's two TensorCores >=2 grid steps to shard whenever possible.
    if padded // tile_b < 2 and padded >= 32:
        tile_b = _round_up(pl.cdiv(padded, 2), 16)
        padded = _round_up(batch, tile_b)
    if padded != batch:
        x2d = jnp.pad(x2d, ((0, padded - batch), (0, 0)))

    grid = (padded // tile_b,)

    # Activations are batch-tiled (double-buffered); weights/biases use a
    # constant index map so they are DMA'd once and stay VMEM-resident, and
    # are single-buffered since their block index never changes.
    def const_spec(shape):
        return pl.BlockSpec(shape, lambda i: (0, 0), pipeline_mode=pl.Buffered(1))

    in_specs = [pl.BlockSpec((tile_b, D_IN), lambda i: (i, 0))]
    for ws_, bs_ in zip(_W_SHAPES, _B_SHAPES):
        in_specs.append(const_spec(ws_))
        in_specs.append(const_spec(bs_))

    cost = pl.CostEstimate(
        flops=_FLOPS_PER_ROW * padded,
        transcendentals=0,
        bytes_accessed=(padded * D_IN * 2            # bf16 input
                        + _PARAM_BYTES               # resident params
                        + padded * D_OUT_PAD * 4),   # f32 output
    )

    out = pl.pallas_call(
        mlp_kernel,
        out_shape=jax.ShapeDtypeStruct((padded, D_OUT_PAD), jnp.float32),
        grid=grid,
        in_specs=in_specs,
        out_specs=pl.BlockSpec((tile_b, D_OUT_PAD), lambda i: (i, 0)),
        compiler_params=pltpu.CompilerParams(
            dimension_semantics=("parallel",),        # megacore sharding on v7x
            # Explicit, portable budget: ~13 MiB worst case at tile_b=1024,
            # so 32 MiB works across v5e/v6e/v7x scoped defaults (16/32/32).
            vmem_limit_bytes=32 * 1024 * 1024,
        ),
        cost_estimate=cost,
    )(x2d, *flat_params)

    return out[:batch, :N_CLASSES]


def init_params(key):
    """Deterministic synthetic parameters matching the PyTorch module's shapes.

    PyTorch Linear(in, out) stores weight (out, in); we store the transpose
    (in, out) so the kernel can do x @ W directly.  Biases are (1, out).
    """
    dims = [(784, 512), (512, 256), (256, 128), (128, 64), (64, 10)]
    params = []
    for (fan_in, fan_out) in dims:
        key, kw, kb = jax.random.split(key, 3)
        bound = 1.0 / jnp.sqrt(fan_in)
        w = jax.random.uniform(kw, (fan_in, fan_out), jnp.float32, -bound, bound)
        b = jax.random.uniform(kb, (1, fan_out), jnp.float32, -bound, bound)
        params.append((w, b))
    return params


if __name__ == "__main__":
    key = jax.random.PRNGKey(0)
    key, kx = jax.random.split(key)

    # Small, module-consistent input: batch=2 MNIST-like NCHW images.
    x = jax.random.normal(kx, (2, 1, 28, 28), dtype=jnp.float32)

    params = init_params(key)
    flat_params = prepare_params(params)

    out = net_forward(x, flat_params)
    out = jax.block_until_ready(out)

    assert out.shape == (2, 10), out.shape
    assert out.dtype == jnp.float32

    # Cross-check against a plain-JAX reference using the same bf16 weights /
    # bf16 activations and f32 accumulation as the kernel (validates padding,
    # tiling, bias-add and ReLU placement).
    h = x.reshape(-1, 784)
    for i, (w, b) in enumerate(params):
        h = jnp.dot(h.astype(jnp.bfloat16), w.astype(jnp.bfloat16),
                    preferred_element_type=jnp.float32) + b
        if i < 4:
            h = jnp.maximum(h, 0.0)
    assert jnp.allclose(out, h, atol=1e-2, rtol=1e-2), (
        float(jnp.max(jnp.abs(out - h))))

    print("KERNEL_OK")
</pallas_src>

<mosaic_0001>
module attributes {stable_mosaic.version = 11 : i64} {
  func.func @mlp_kernel(%arg0: i32, %arg1: memref<16x784xbf16, #tpu.memory_space<vmem>>, %arg2: memref<784x512xbf16, #tpu.memory_space<vmem>>, %arg3: memref<1x512xf32, #tpu.memory_space<vmem>>, %arg4: memref<512x256xbf16, #tpu.memory_space<vmem>>, %arg5: memref<1x256xf32, #tpu.memory_space<vmem>>, %arg6: memref<256x128xbf16, #tpu.memory_space<vmem>>, %arg7: memref<1x128xf32, #tpu.memory_space<vmem>>, %arg8: memref<128x128xbf16, #tpu.memory_space<vmem>>, %arg9: memref<1x128xf32, #tpu.memory_space<vmem>>, %arg10: memref<128x128xbf16, #tpu.memory_space<vmem>>, %arg11: memref<1x128xf32, #tpu.memory_space<vmem>>, %arg12: memref<16x128xf32, #tpu.memory_space<vmem>>) attributes {dimension_semantics = [#tpu.dimension_semantics<parallel>], iteration_bounds = array<i64: 1>, scalar_prefetch = 0 : i64, scratch_operands = 0 : i64, tpu.core_type = #tpu.core_type<tc>, window_params = [{transform_indices = @transform_0, window_bounds = array<i64: 16, 784>}, {pipeline_mode = #tpu.pipeline_mode<synchronous>, transform_indices = @transform_1, window_bounds = array<i64: 784, 512>}, {pipeline_mode = #tpu.pipeline_mode<synchronous>, transform_indices = @transform_2, window_bounds = array<i64: 1, 512>}, {pipeline_mode = #tpu.pipeline_mode<synchronous>, transform_indices = @transform_3, window_bounds = array<i64: 512, 256>}, {pipeline_mode = #tpu.pipeline_mode<synchronous>, transform_indices = @transform_4, window_bounds = array<i64: 1, 256>}, {pipeline_mode = #tpu.pipeline_mode<synchronous>, transform_indices = @transform_5, window_bounds = array<i64: 256, 128>}, {pipeline_mode = #tpu.pipeline_mode<synchronous>, transform_indices = @transform_6, window_bounds = array<i64: 1, 128>}, {pipeline_mode = #tpu.pipeline_mode<synchronous>, transform_indices = @transform_7, window_bounds = array<i64: 128, 128>}, {pipeline_mode = #tpu.pipeline_mode<synchronous>, transform_indices = @transform_8, window_bounds = array<i64: 1, 128>}, {pipeline_mode = #tpu.pipeline_mode<synchronous>, transform_indices = @transform_9, window_bounds = array<i64: 128, 128>}, {pipeline_mode = #tpu.pipeline_mode<synchronous>, transform_indices = @transform_10, window_bounds = array<i64: 1, 128>}, {transform_indices = @transform_11, window_bounds = array<i64: 16, 128>}]} {
    %c0 = arith.constant 0 : index
    %c0_0 = arith.constant 0 : index
    %0 = vector.load %arg1[%c0, %c0_0] : memref<16x784xbf16, #tpu.memory_space<vmem>>, vector<16x784xbf16>
    %c0_1 = arith.constant 0 : index
    %c0_2 = arith.constant 0 : index
    %1 = vector.load %arg2[%c0_1, %c0_2] : memref<784x512xbf16, #tpu.memory_space<vmem>>, vector<784x512xbf16>
    %cst = arith.constant dense<0.000000e+00> : vector<16x512xf32>
    %2 = tpu.matmul %0, %1, %cst {dimension_numbers = #tpu.dot_dimension_numbers<[1], [0], [0], [1], [0, 0, 1, 1], [], []>} : vector<16x784xbf16>, vector<784x512xbf16>, vector<16x512xf32> -> vector<16x512xf32>
    %c0_3 = arith.constant 0 : index
    %c0_4 = arith.constant 0 : index
    %3 = vector.load %arg3[%c0_3, %c0_4] : memref<1x512xf32, #tpu.memory_space<vmem>>, vector<1x512xf32>
    %4 = vector.broadcast %3 : vector<1x512xf32> to vector<16x512xf32>
    %5 = arith.addf %2, %4 : vector<16x512xf32>
    %cst_5 = arith.constant 0.000000e+00 : f32
    %6 = vector.broadcast %cst_5 : f32 to vector<16x512xf32>
    %7 = arith.maximumf %5, %6 : vector<16x512xf32>
    %8 = arith.truncf %7 : vector<16x512xf32> to vector<16x512xbf16>
    %c0_6 = arith.constant 0 : index
    %c0_7 = arith.constant 0 : index
    %9 = vector.load %arg4[%c0_6, %c0_7] : memref<512x256xbf16, #tpu.memory_space<vmem>>, vector<512x256xbf16>
    %cst_8 = arith.constant dense<0.000000e+00> : vector<16x256xf32>
    %10 = tpu.matmul %8, %9, %cst_8 {dimension_numbers = #tpu.dot_dimension_numbers<[1], [0], [0], [1], [0, 0, 1, 1], [], []>} : vector<16x512xbf16>, vector<512x256xbf16>, vector<16x256xf32> -> vector<16x256xf32>
    %c0_9 = arith.constant 0 : index
    %c0_10 = arith.constant 0 : index
    %11 = vector.load %arg5[%c0_9, %c0_10] : memref<1x256xf32, #tpu.memory_space<vmem>>, vector<1x256xf32>
    %12 = vector.broadcast %11 : vector<1x256xf32> to vector<16x256xf32>
    %13 = arith.addf %10, %12 : vector<16x256xf32>
    %cst_11 = arith.constant 0.000000e+00 : f32
    %14 = vector.broadcast %cst_11 : f32 to vector<16x256xf32>
    %15 = arith.maximumf %13, %14 : vector<16x256xf32>
    %16 = arith.truncf %15 : vector<16x256xf32> to vector<16x256xbf16>
    %c0_12 = arith.constant 0 : index
    %c0_13 = arith.constant 0 : index
    %17 = vector.load %arg6[%c0_12, %c0_13] : memref<256x128xbf16, #tpu.memory_space<vmem>>, vector<256x128xbf16>
    %cst_14 = arith.constant dense<0.000000e+00> : vector<16x128xf32>
    %18 = tpu.matmul %16, %17, %cst_14 {dimension_numbers = #tpu.dot_dimension_numbers<[1], [0], [0], [1], [0, 0, 1, 1], [], []>} : vector<16x256xbf16>, vector<256x128xbf16>, vector<16x128xf32> -> vector<16x128xf32>
    %c0_15 = arith.constant 0 : index
    %c0_16 = arith.constant 0 : index
    %19 = vector.load %arg7[%c0_15, %c0_16] : memref<1x128xf32, #tpu.memory_space<vmem>>, vector<1x128xf32>
    %20 = vector.broadcast %19 : vector<1x128xf32> to vector<16x128xf32>
    %21 = arith.addf %18, %20 : vector<16x128xf32>
    %cst_17 = arith.constant 0.000000e+00 : f32
    %22 = vector.broadcast %cst_17 : f32 to vector<16x128xf32>
    %23 = arith.maximumf %21, %22 : vector<16x128xf32>
    %24 = arith.truncf %23 : vector<16x128xf32> to vector<16x128xbf16>
    %c0_18 = arith.constant 0 : index
    %c0_19 = arith.constant 0 : index
    %25 = vector.load %arg8[%c0_18, %c0_19] : memref<128x128xbf16, #tpu.memory_space<vmem>>, vector<128x128xbf16>
    %cst_20 = arith.constant dense<0.000000e+00> : vector<16x128xf32>
    %26 = tpu.matmul %24, %25, %cst_20 {dimension_numbers = #tpu.dot_dimension_numbers<[1], [0], [0], [1], [0, 0, 1, 1], [], []>} : vector<16x128xbf16>, vector<128x128xbf16>, vector<16x128xf32> -> vector<16x128xf32>
    %c0_21 = arith.constant 0 : index
    %c0_22 = arith.constant 0 : index
    %27 = vector.load %arg9[%c0_21, %c0_22] : memref<1x128xf32, #tpu.memory_space<vmem>>, vector<1x128xf32>
    %28 = vector.broadcast %27 : vector<1x128xf32> to vector<16x128xf32>
    %29 = arith.addf %26, %28 : vector<16x128xf32>
    %cst_23 = arith.constant 0.000000e+00 : f32
    %30 = vector.broadcast %cst_23 : f32 to vector<16x128xf32>
    %31 = arith.maximumf %29, %30 : vector<16x128xf32>
    %32 = arith.truncf %31 : vector<16x128xf32> to vector<16x128xbf16>
    %c0_24 = arith.constant 0 : index
    %c0_25 = arith.constant 0 : index
    %33 = vector.load %arg10[%c0_24, %c0_25] : memref<128x128xbf16, #tpu.memory_space<vmem>>, vector<128x128xbf16>
    %cst_26 = arith.constant dense<0.000000e+00> : vector<16x128xf32>
    %34 = tpu.matmul %32, %33, %cst_26 {dimension_numbers = #tpu.dot_dimension_numbers<[1], [0], [0], [1], [0, 0, 1, 1], [], []>} : vector<16x128xbf16>, vector<128x128xbf16>, vector<16x128xf32> -> vector<16x128xf32>
    %c0_27 = arith.constant 0 : index
    %c0_28 = arith.constant 0 : index
    %35 = vector.load %arg11[%c0_27, %c0_28] : memref<1x128xf32, #tpu.memory_space<vmem>>, vector<1x128xf32>
    %36 = vector.broadcast %35 : vector<1x128xf32> to vector<16x128xf32>
    %37 = arith.addf %34, %36 : vector<16x128xf32>
    %c0_29 = arith.constant 0 : index
    %c0_30 = arith.constant 0 : index
    %38 = vector.load %arg12[%c0_29, %c0_30] : memref<16x128xf32, #tpu.memory_space<vmem>>, vector<16x128xf32>
    tpu.vector_store %arg12[%c0_29, %c0_30], %37 {strides = array<i32>} : memref<16x128xf32, #tpu.memory_space<vmem>>, vector<16x128xf32>,
    return
  }
  func.func @transform_0(%arg0: i32) -> (i32, i32) {
    %c0_i32 = arith.constant 0 : i32
    %c0_i32_0 = arith.constant 0 : i32
    return %arg0, %c0_i32 : i32, i32
  }
  func.func @transform_1(%arg0: i32) -> (i32, i32) {
    %c0_i32 = arith.constant 0 : i32
    %c0_i32_0 = arith.constant 0 : i32
    %c0_i32_1 = arith.constant 0 : i32
    return %c0_i32, %c0_i32_0 : i32, i32
  }
  func.func @transform_2(%arg0: i32) -> (i32, i32) {
    %c0_i32 = arith.constant 0 : i32
    %c0_i32_0 = arith.constant 0 : i32
    %c0_i32_1 = arith.constant 0 : i32
    return %c0_i32, %c0_i32_0 : i32, i32
  }
  func.func @transform_3(%arg0: i32) -> (i32, i32) {
    %c0_i32 = arith.constant 0 : i32
    %c0_i32_0 = arith.constant 0 : i32
    %c0_i32_1 = arith.constant 0 : i32
    return %c0_i32, %c0_i32_0 : i32, i32
  }
  func.func @transform_4(%arg0: i32) -> (i32, i32) {
    %c0_i32 = arith.constant 0 : i32
    %c0_i32_0 = arith.constant 0 : i32
    %c0_i32_1 = arith.constant 0 : i32
    return %c0_i32, %c0_i32_0 : i32, i32
  }
  func.func @transform_5(%arg0: i32) -> (i32, i32) {
    %c0_i32 = arith.constant 0 : i32
    %c0_i32_0 = arith.constant 0 : i32
    %c0_i32_1 = arith.constant 0 : i32
    return %c0_i32, %c0_i32_0 : i32, i32
  }
  func.func @transform_6(%arg0: i32) -> (i32, i32) {
    %c0_i32 = arith.constant 0 : i32
    %c0_i32_0 = arith.constant 0 : i32
    %c0_i32_1 = arith.constant 0 : i32
    return %c0_i32, %c0_i32_0 : i32, i32
  }
  func.func @transform_7(%arg0: i32) -> (i32, i32) {
    %c0_i32 = arith.constant 0 : i32
    %c0_i32_0 = arith.constant 0 : i32
    %c0_i32_1 = arith.constant 0 : i32
    return %c0_i32, %c0_i32_0 : i32, i32
  }
  func.func @transform_8(%arg0: i32) -> (i32, i32) {
    %c0_i32 = arith.constant 0 : i32
    %c0_i32_0 = arith.constant 0 : i32
    %c0_i32_1 = arith.constant 0 : i32
    return %c0_i32, %c0_i32_0 : i32, i32
  }
  func.func @transform_9(%arg0: i32) -> (i32, i32) {
    %c0_i32 = arith.constant 0 : i32
    %c0_i32_0 = arith.constant 0 : i32
    %c0_i32_1 = arith.constant 0 : i32
    return %c0_i32, %c0_i32_0 : i32, i32
  }
  func.func @transform_10(%arg0: i32) -> (i32, i32) {
    %c0_i32 = arith.constant 0 : i32
    %c0_i32_0 = arith.constant 0 : i32
    %c0_i32_1 = arith.constant 0 : i32
    return %c0_i32, %c0_i32_0 : i32, i32
  }
  func.func @transform_11(%arg0: i32) -> (i32, i32) {
    %c0_i32 = arith.constant 0 : i32
    %c0_i32_0 = arith.constant 0 : i32
    return %arg0, %c0_i32 : i32, i32
  }
}

</mosaic_0001>

<bundles_post_ra>
// kernel: tpu_custom_call.1
= control target key start
LH: loop header
LB: loop body
LE: loop exit
PB: predicated region body
PF: predicated region fallthrough
CT: control target
= control target key end

     0   :  { %16 = vsyncpa [#allocation3], 0  ;;  %s3927_s0 = inlined_call_operand.hbm [shape: bf16[16,784], index: 0, kind: input, shape index: {}]   ;;  %s3928_s1 = inlined_call_operand.hbm [shape: bf16[784,512], index: 1, kind: input, shape index: {}]   ;;  %s3929_s2 = inlined_call_operand.vmem [shape: f32[1,512], index: 2, kind: input, shape index: {}]   ;;  %s3930_s3 = inlined_call_operand.hbm [shape: bf16[512,256], index: 3, kind: input, shape index: {}]   ;;  %s3931_s4 = inlined_call_operand.vmem [shape: f32[1,256], index: 4, kind: input, shape index: {}]   ;;  %s3932_s5 = inlined_call_operand.hbm [shape: bf16[256,128], index: 5, kind: input, shape index: {}]   ;;  %s3933_s6 = inlined_call_operand.vmem [shape: f32[1,128], index: 6, kind: input, shape index: {}]   ;;  %s3934_s7 = inlined_call_operand.hbm [shape: bf16[128,128], index: 7, kind: input, shape index: {}]   ;;  %s3935_s8 = inlined_call_operand.vmem [shape: f32[1,128], index: 8, kind: input, shape index: {}]   ;;  %s3936_s9 = inlined_call_operand.hbm [shape: bf16[128,128], index: 9, kind: input, shape index: {}]   ;;  %s3937_s10 = inlined_call_operand.vmem [shape: f32[1,128], index: 10, kind: input, shape index: {}]   ;;  %s3938_s11 = inlined_call_operand.hbm [shape: f32[16,128], index: 11, kind: output, shape index: {}]  }
   0x1   :  { %17 = vsyncpa [#allocation6], 0 }
   0x2   :  { %18 = vsyncpa [#allocation9], 0 }
   0x3   :  { %19 = vsyncpa [#allocation12], 0 }
   0x4   :  { %20 = vsyncpa [#allocation4], 0  ;;  %s3678_s17 = smov [#allocation5]   ;;  %s3514_s21 = scalar_lea.hbm %s3928_s1, 25088 }
   0x5   :  { %s38_s18 = sshll.u32 %s3678_s17, 4  ;;  %p3515_p0 = scmp.ne.s32.totalorder %s3928_s1, %s3514_s21  ;;  %s39_s18 = int_to_ptr.vmem [resolvable:$true] %s38_s18 }
   0x6   :  { %p3518_p1 = scmp.lt.u32.totalorder %s3514_s21, %s3928_s1 }
   0x8   :  { %p3520_p2 = pnand %p3518_p1, %p3515_p0 }
   0xa   :  { %3523 = shalt.err (!%p3520_p2)
}
   0xb   :  { %s3524_s26 = scalar_lea.vmem %s39_s18, 25088  ;;  %p3529_p4 = scmp.lt.s32.totalorder %s39_s18, %s39_s18 }
   0xc   :  { %p3525_p3 = scmp.ne.s32.totalorder %s39_s18, %s3524_s26  ;;  %p3530_p5 = scmp.lt.s32.totalorder %s3524_s26, %s3524_s26 }
   0xe   :  { %p3531_p6 = por %p3530_p5, %p3529_p4 }
  0x10   :  { %p3532_p7 = pnand %p3531_p6, %p3525_p3 }
  0x12   :  { %3535 = shalt.err (!%p3532_p7)
}
  0x13   :  { %s3679_s27 = smov 256   ;;  %s3680_s28 = smov 16  }
  0x14   :  { %44 = dma.hbm_to_vmem [thread:$0]  %s3928_s1, 25088, %s39_s18, [#allocation6], %s3679_s27, %s3679_s27, %s3680_s28  }
  0x15   :  { %s3681_s12 = smov [#allocation8]   ;;  %s3536_s16 = scalar_lea.hbm %s3932_s5, 2048 }
  0x16   :  { %s66_s13 = sshll.u32 %s3681_s12, 4  ;;  %p3537_p8 = scmp.ne.s32.totalorder %s3932_s5, %s3536_s16  ;;  %s67_s13 = int_to_ptr.vmem [resolvable:$true] %s66_s13 }
  0x17   :  { %p3540_p9 = scmp.lt.u32.totalorder %s3536_s16, %s3932_s5 }
  0x19   :  { %p3542_p10 = pnand %p3540_p9, %p3537_p8 }
  0x1b   :  { %3545 = shalt.err (!%p3542_p10)
}
  0x1c   :  { %s3546_s22 = scalar_lea.vmem %s67_s13, 2048  ;;  %p3551_p12 = scmp.lt.s32.totalorder %s67_s13, %s67_s13 }
  0x1d   :  { %p3547_p11 = scmp.ne.s32.totalorder %s67_s13, %s3546_s22  ;;  %p3552_p13 = scmp.lt.s32.totalorder %s3546_s22, %s3546_s22 }
  0x1f   :  { %p3553_p0 = por %p3552_p13, %p3551_p12 }
  0x21   :  { %p3554_p1 = pnand %p3553_p0, %p3547_p11 }
  0x23   :  { %3557 = shalt.err (!%p3554_p1)
}
  0x24   :  { %s3682_s1 = smov 64   ;;  %s3683_s18 = smov 4  }
  0x25   :  { %72 = dma.hbm_to_vmem [thread:$0]  %s3932_s5, 2048, %s67_s13, [#allocation9], %s3682_s1, %s3682_s1, %s3683_s18  }
  0x26   :  { %s3684_s25 = smov [#allocation2]   ;;  %s3558_s29 = scalar_lea.hbm %s3927_s0, 896 }
  0x27   :  { %s26_s26 = sshll.u32 %s3684_s25, 4  ;;  %p3559_p2 = scmp.ne.s32.totalorder %s3927_s0, %s3558_s29  ;;  %s27_s26 = int_to_ptr.vmem [resolvable:$true] %s26_s26 }
  0x28   :  { %p3562_p3 = scmp.lt.u32.totalorder %s3558_s29, %s3927_s0 }
  0x2a   :  { %p3564_p4 = pnand %p3562_p3, %p3559_p2 }
  0x2c   :  { %3567 = shalt.err (!%p3564_p4)
}
  0x2d   :  { %s3568_s16 = scalar_lea.vmem %s27_s26, 896  ;;  %p3573_p6 = scmp.lt.s32.totalorder %s27_s26, %s27_s26 }
  0x2e   :  { %p3569_p5 = scmp.ne.s32.totalorder %s27_s26, %s3568_s16  ;;  %p3574_p7 = scmp.lt.s32.totalorder %s3568_s16, %s3568_s16 }
  0x30   :  { %p3575_p8 = por %p3574_p7, %p3573_p6 }
  0x32   :  { %p3576_p9 = pnand %p3575_p8, %p3569_p5 }
  0x34   :  { %3579 = shalt.err (!%p3576_p9)
}
  0x35   :  { %s3685_s5 = smov 448   ;;  %s3686_s13 = smov 28  }
  0x36   :  { %32 = dma.hbm_to_vmem [thread:$0]  %s3927_s0, 896, %s27_s26, [#allocation3], %s3685_s5, %s3685_s5, %s3686_s13  }
  0x37   :  { %s3687_s20 = smov [#allocation7]   ;;  %s3580_s24 = scalar_lea.hbm %s3930_s3, 8192 }
  0x38   :  { %s52_s21 = sshll.u32 %s3687_s20, 4  ;;  %p3581_p10 = scmp.ne.s32.totalorder %s3930_s3, %s3580_s24  ;;  %s53_s21 = int_to_ptr.vmem [resolvable:$true] %s52_s21 }
  0x39   :  { %p3584_p11 = scmp.lt.u32.totalorder %s3580_s24, %s3930_s3 }
  0x3b   :  { %p3586_p12 = pnand %p3584_p11, %p3581_p10 }
  0x3d   :  { %3589 = shalt.err (!%p3586_p12)
}
  0x3e   :  { %s3590_s30 = scalar_lea.vmem %s53_s21, 8192  ;;  %p3595_p0 = scmp.lt.s32.totalorder %s53_s21, %s53_s21 }
  0x3f   :  { %p3591_p13 = scmp.ne.s32.totalorder %s53_s21, %s3590_s30  ;;  %p3596_p1 = scmp.lt.s32.totalorder %s3590_s30, %s3590_s30 }
  0x41   :  { %p3597_p2 = por %p3596_p1, %p3595_p0 }
  0x43   :  { %p3598_p3 = pnand %p3597_p2, %p3591_p13 }
  0x45   :  { %3601 = shalt.err (!%p3598_p3)
}
  0x46   :  { %s3688_s0 = smov 128   ;;  %s3689_s26 = smov 8  }
  0x47   :  { %58 = dma.hbm_to_vmem [thread:$0]  %s3930_s3, 8192, %s53_s21, [#allocation6], %s3688_s0, %s3688_s0, %s3689_s26  }
  0x48   :  { %s3690_s15 = smov [#allocation10]   ;;  %s3691_s5 = smov [#allocation11]  }
  0x49   :  { %s80_s16 = sshll.u32 %s3690_s15, 4  ;;  %s94_s13 = sshll.u32 %s3691_s5, 4  ;;  %s81_s16 = int_to_ptr.vmem [resolvable:$true] %s80_s16  ;;  %s3810_s13 = int_to_ptr.vmem [resolvable:$true] %s94_s13 }
  0x4a   :  { %s3602_s20 = scalar_lea.hbm %s3934_s7, 1024 }
  0x4b   :  { %p3603_p4 = scmp.ne.s32.totalorder %s3934_s7, %s3602_s20  ;;  %p3606_p5 = scmp.lt.u32.totalorder %s3602_s20, %s3934_s7 }
  0x4d   :  { %p3608_p6 = pnand %p3606_p5, %p3603_p4 }
  0x4f   :  { %3611 = shalt.err (!%p3608_p6)
}
  0x50   :  { %s3612_s3 = scalar_lea.vmem %s81_s16, 1024  ;;  %p3617_p8 = scmp.lt.s32.totalorder %s81_s16, %s81_s16 }
  0x51   :  { %p3613_p7 = scmp.ne.s32.totalorder %s81_s16, %s3612_s3  ;;  %p3618_p9 = scmp.lt.s32.totalorder %s3612_s3, %s3612_s3 }
  0x53   :  { %p3619_p10 = por %p3618_p9, %p3617_p8 }
  0x55   :  { %p3620_p11 = pnand %p3619_p10, %p3613_p7 }
  0x57   :  { %3623 = shalt.err (!%p3620_p11)
}
  0x58   :  { %86 = dma.hbm_to_vmem [thread:$0]  %s3934_s7, 1024, %s81_s16, [#allocation9], %s3682_s1, %s3682_s1, %s3683_s18  }
  0x59   :  { %s3624_s30 = scalar_lea.hbm %s3936_s9, 1024 }
  0x5a   :  { %p3625_p12 = scmp.ne.s32.totalorder %s3936_s9, %s3624_s30  ;;  %p3628_p13 = scmp.lt.u32.totalorder %s3624_s30, %s3936_s9 }
  0x5c   :  { %p3630_p0 = pnand %p3628_p13, %p3625_p12 }
  0x5e   :  { %3633 = shalt.err (!%p3630_p0)
}
  0x5f   :  { %s3634_s17 = scalar_lea.vmem %s3810_s13, 1024  ;;  %p3639_p2 = scmp.lt.s32.totalorder %s3810_s13, %s3810_s13 }
  0x60   :  { %p3635_p1 = scmp.ne.s32.totalorder %s3810_s13, %s3634_s17  ;;  %p3640_p3 = scmp.lt.s32.totalorder %s3634_s17, %s3634_s17 }
  0x62   :  { %p3641_p4 = por %p3640_p3, %p3639_p2 }
  0x64   :  { %p3642_p5 = pnand %p3641_p4, %p3635_p1 }
  0x66   :  { %3645 = shalt.err (!%p3642_p5)
}
  0x67   :  { %100 = dma.hbm_to_vmem [thread:$0]  %s3936_s9, 1024, %s3810_s13, [#allocation12], %s3682_s1, %s3682_s1, %s3683_s18  }
  0x68   :  { %3668 = dma.done.wait [#allocation3], 896  }
  0x69   :  { %3669 = vsyncadd [#allocation3], 4294966400 }
  0x6a   :  { %3670 = dma.done.wait [#allocation6], 33280  }
  0x6b   :  { %3671 = vsyncadd [#allocation6], 4294934016 }
  0x6c   :  { %3672 = dma.done.wait [#allocation9], 3072  }
  0x6d   :  { %3673 = vsyncadd [#allocation9], 4294964224 }
  0x6e   :  { %3674 = dma.done.wait [#allocation12], 1024  }
  0x6f   :  { %3675 = vsyncadd [#allocation12], 4294966272  ;;  %v3692_v0 = vmov 0   ;;  %v3081_v1 = vld [vmem:[#allocation5 + $0x4] ss:$16 sps:$4 sm:$0xff]   ;;  %vm1363_vm0 = vcmask 130048  }
  0x70   :  { %1528 = vmatprep.mubr.bf16.mxu1 %v3692_v0  ;;  %v3083_v2 = vld [vmem:[#allocation5 + $0x604] ss:$16 sps:$4 sm:$0xff]   ;;  %1367 = vmatprep.subr.bf16.mxu0 %v3081_v1  ;;  %v3085_v3 = vld [vmem:[#allocation5] ss:$16 sps:$4 sm:$0xff]   ;;  %v3089_v6 = vld [vmem:[#allocation5 + $0x8] ss:$16 sps:$4 sm:$0xff]  }
  0x71   :  { %v3086_v4 = vld [vmem:[#allocation5 + $0x600] ss:$16 sps:$4 sm:$0xff]   ;;  %1496 = vmatprep.subr.bf16.mxu1 %v3083_v2  ;;  %v3087_v5 = vld [vmem:[#allocation5 + $0x24] ss:$16 sps:$4 sm:$0xff]   ;;  %1368 = vmatpush1.bf16.msra.mxu0 %v3085_v3  ;;  %v3091_v7 = vld [vmem:[#allocation5 + $0xc] ss:$16 sps:$4 sm:$0xff]  }
  0x72   :  { %1497 = vmatpush1.bf16.msra.mxu1 %v3086_v4  ;;  %1369 = vmatprep.subr.bf16.mxu0 %v3087_v5  ;;  %v3092_v8 = vld [vmem:[#allocation5 + $0x20] ss:$16 sps:$4 sm:$0xff]   ;;  %v3094_v10 = vld [vmem:[#allocation5 + $0x44] ss:$16 sps:$4 sm:$0xff]   ;;  %v3096_v11 = vld [vmem:[#allocation5 + $0x28] ss:$16 sps:$4 sm:$0xff]  }
  0x73   :  { %1539 = vmatprep.subr.bf16.mxu1 %v3091_v7  ;;  %v3093_v9 = vld [vmem:[#allocation2 + $0x18] ss:$28 sps:$4 sm:$0xff]   ;;  %v3100_v14 = vld [vmem:[#allocation5 + $0x64] ss:$16 sps:$4 sm:$0xff]   ;;  %v3102_v17 = vld [vmem:[#allocation5 + $0x48] ss:$16 sps:$4 sm:$0xff]  }
  0x74   :  { %v3098_v12 = vld [vmem:[#allocation5 + $0x2c] ss:$16 sps:$4 sm:$0xff]   ;;  %v3099_v13 = vld [vmem:[#allocation5 + $0x40] ss:$16 sps:$4 sm:$0xff]   ;;  %v3106_v18 = vld [vmem:[#allocation5 + $0x84] ss:$16 sps:$4 sm:$0xff]  }
  0x75   :  { %1370 = vmatpush1.bf16.msra.mxu0 %v3092_v8  ;;  %2842 = vmatmul.mubr.msk.bf16.vlgmr.msra.gmra.mrb[0].mxu1 %vm1363_vm0, %v3093_v9  ;;  %v3104_v15 = vld [vmem:[#allocation5 + $0x4c] ss:$16 sps:$4 sm:$0xff]   ;;  %v3105_v16 = vld [vmem:[#allocation5 + $0x60] ss:$16 sps:$4 sm:$0xff]   ;;  %v3108_v20 = vld [vmem:[#allocation5 + $0x68] ss:$16 sps:$4 sm:$0xff]  }
  0x76   :  { %1540 = vmatpush1.bf16.msra.mxu1 %v3089_v6  ;;  %1371 = vmatprep.subr.bf16.mxu0 %v3094_v10  ;;  %v3110_v19 = vld [vmem:[#allocation5 + $0x6c] ss:$16 sps:$4 sm:$0xff]   ;;  %v3111_v21 = vld [vmem:[#allocation5 + $0x80] ss:$16 sps:$4 sm:$0xff]   ;;  %v3112_v22 = vld [vmem:[#allocation5 + $0xa4] ss:$16 sps:$4 sm:$0xff]  }
  0x77   :  { %1541 = vmatprep.subr.bf16.mxu1 %v3098_v12  ;;  %v3116_v23 = vld [vmem:[#allocation5 + $0x8c] ss:$16 sps:$4 sm:$0xff]   ;;  %v3117_v24 = vld [vmem:[#allocation5 + $0xa0] ss:$16 sps:$4 sm:$0xff]   ;;  %v3114_v25 = vld [vmem:[#allocation5 + $0x88] ss:$16 sps:$4 sm:$0xff]  }
  0x78   :  { %v3118_v26 = vld [vmem:[#allocation5 + $0xc4] ss:$16 sps:$4 sm:$0xff]   ;;  %v3122_v27 = vld [vmem:[#allocation5 + $0xac] ss:$16 sps:$4 sm:$0xff]   ;;  %v3120_v28 = vld [vmem:[#allocation5 + $0xa8] ss:$16 sps:$4 sm:$0xff]  }
  0x79   :  { %1372 = vmatpush1.bf16.msra.mxu0 %v3099_v13  ;;  %v3123_v29 = vld [vmem:[#allocation5 + $0xc0] ss:$16 sps:$4 sm:$0xff]   ;;  %v3124_v30 = vld [vmem:[#allocation5 + $0xe4] ss:$16 sps:$4 sm:$0xff]   ;;  %v3128_v31 = vld [vmem:[#allocation5 + $0xcc] ss:$16 sps:$4 sm:$0xff]  }
  0x7a   :  { %1542 = vmatpush1.bf16.msra.mxu1 %v3096_v11  ;;  %1373 = vmatprep.subr.bf16.mxu0 %v3100_v14  ;;  %v3129_v32 = vld [vmem:[#allocation5 + $0xe0] ss:$16 sps:$4 sm:$0xff]   ;;  %v3126_v33 = vld [vmem:[#allocation5 + $0xc8] ss:$16 sps:$4 sm:$0xff]   ;;  %v3130_v34 = vld [vmem:[#allocation5 + $0x104] ss:$16 sps:$4 sm:$0xff]  }
  0x7b   :  { %1543 = vmatprep.subr.bf16.mxu1 %v3104_v15  ;;  %v3134_v35 = vld [vmem:[#allocation5 + $0xec] ss:$16 sps:$4 sm:$0xff]   ;;  %v3132_v36 = vld [vmem:[#allocation5 + $0xe8] ss:$16 sps:$4 sm:$0xff]   ;;  %v3135_v37 = vld [vmem:[#allocation5 + $0x100] ss:$16 sps:$4 sm:$0xff]  }
  0x7c   :  { %v3136_v38 = vld [vmem:[#allocation5 + $0x124] ss:$16 sps:$4 sm:$0xff]   ;;  %v3140_v39 = vld [vmem:[#allocation5 + $0x10c] ss:$16 sps:$4 sm:$0xff]   ;;  %v3141_v40 = vld [vmem:[#allocation5 + $0x120] ss:$16 sps:$4 sm:$0xff]  }
  0x7d   :  { %1374 = vmatpush1.bf16.msra.mxu0 %v3105_v16  ;;  %v3138_v41 = vld [vmem:[#allocation5 + $0x108] ss:$16 sps:$4 sm:$0xff]   ;;  %v3142_v42 = vld [vmem:[#allocation5 + $0x144] ss:$16 sps:$4 sm:$0xff]   ;;  %v3146_v43 = vld [vmem:[#allocation5 + $0x12c] ss:$16 sps:$4 sm:$0xff]  }
  0x7e   :  { %1544 = vmatpush1.bf16.msra.mxu1 %v3102_v17  ;;  %1375 = vmatprep.subr.bf16.mxu0 %v3106_v18  ;;  %v3144_v44 = vld [vmem:[#allocation5 + $0x128] ss:$16 sps:$4 sm:$0xff]   ;;  %v3147_v45 = vld [vmem:[#allocation5 + $0x140] ss:$16 sps:$4 sm:$0xff]   ;;  %v3148_v46 = vld [vmem:[#allocation5 + $0x164] ss:$16 sps:$4 sm:$0xff]  }
  0x7f   :  { %1545 = vmatprep.subr.bf16.mxu1 %v3110_v19  ;;  %v3152_v47 = vld [vmem:[#allocation5 + $0x14c] ss:$16 sps:$4 sm:$0xff]   ;;  %v3150_v48 = vld [vmem:[#allocation5 + $0x148] ss:$16 sps:$4 sm:$0xff]   ;;  %v3153_v49 = vld [vmem:[#allocation5 + $0x160] ss:$16 sps:$4 sm:$0xff]  }
  0x80   :  { %v3180_v50 = vld [vmem:[#allocation2 + $0x4] ss:$28 sps:$4 sm:$0xff]   ;;  %v3154_v51 = vld [vmem:[#allocation5 + $0x184] ss:$16 sps:$4 sm:$0xff]   ;;  %v3159_v54 = vld [vmem:[#allocation5 + $0x180] ss:$16 sps:$4 sm:$0xff]  }
  0x81   :  { %1376 = vmatpush1.bf16.msra.mxu0 %v3111_v21  ;;  %v3158_v52 = vld [vmem:[#allocation5 + $0x16c] ss:$16 sps:$4 sm:$0xff]   ;;  %1399 = vmatprep.mubr.bf16.mxu0 %v3180_v50  ;;  %v3156_v53 = vld [vmem:[#allocation5 + $0x168] ss:$16 sps:$4 sm:$0xff]   ;;  %v3160_v55 = vld [vmem:[#allocation5 + $0x1a4] ss:$16 sps:$4 sm:$0xff]  }
  0x82   :  { %1546 = vmatpush1.bf16.msra.mxu1 %v3108_v20  ;;  %1377 = vmatprep.subr.bf16.mxu0 %v3112_v22  ;;  %v3164_v56 = vld [vmem:[#allocation5 + $0x18c] ss:$16 sps:$4 sm:$0xff]   ;;  %v3162_v57 = vld [vmem:[#allocation5 + $0x188] ss:$16 sps:$4 sm:$0xff]   ;;  %v3165_v58 = vld [vmem:[#allocation5 + $0x1a0] ss:$16 sps:$4 sm:$0xff]  }
  0x83   :  { %1547 = vmatprep.subr.bf16.mxu1 %v3116_v23  ;;  %1571 = vmatprep.mubr.bf16.mxu1 %v3180_v50  ;;  %v3166_v59 = vld [vmem:[#allocation5 + $0x1c4] ss:$16 sps:$4 sm:$0xff]   ;;  %v3170_v60 = vld [vmem:[#allocation5 + $0x1ac] ss:$16 sps:$4 sm:$0xff]   ;;  %v3168_v61 = vld [vmem:[#allocation5 + $0x1a8] ss:$16 sps:$4 sm:$0xff]  }
  0x84   :  { %v3171_v62 = vld [vmem:[#allocation5 + $0x1c0] ss:$16 sps:$4 sm:$0xff]   ;;  %v3172_v63 = vld [vmem:[#allocation5 + $0x1e4] ss:$16 sps:$4 sm:$0xff]   ;;  %v3176_v1 = vld [vmem:[#allocation5 + $0x1cc] ss:$16 sps:$4 sm:$0xff]  }
  0x85   :  { %1378 = vmatpush1.bf16.msra.mxu0 %v3117_v24  ;;  %v3174_v2 = vld [vmem:[#allocation5 + $0x1c8] ss:$16 sps:$4 sm:$0xff]   ;;  %v3177_v3 = vld [vmem:[#allocation5 + $0x1e0] ss:$16 sps:$4 sm:$0xff]   ;;  %v3183_v4 = vld [vmem:[#allocation5 + $0x204] ss:$16 sps:$4 sm:$0xff]  }
  0x86   :  { %1548 = vmatpush1.bf16.msra.mxu1 %v3114_v25  ;;  %1379 = vmatprep.subr.bf16.mxu0 %v3118_v26  ;;  %v3186_v5 = vld [vmem:[#allocation5 + $0x1ec] ss:$16 sps:$4 sm:$0xff]   ;;  %v3178_v6 = vld [vmem:[#allocation2] ss:$28 sps:$4 sm:$0xff]   ;;  %v3181_v7 = vld [vmem:[#allocation5 + $0x200] ss:$16 sps:$4 sm:$0xff]  }
  0x87   :  { %1549 = vmatprep.subr.bf16.mxu1 %v3122_v27  ;;  %v3184_v8 = vld [vmem:[#allocation5 + $0x1e8] ss:$16 sps:$4 sm:$0xff]   ;;  %v3189_v9 = vld [vmem:[#allocation5 + $0x224] ss:$16 sps:$4 sm:$0xff]   ;;  %v3192_v10 = vld [vmem:[#allocation5 + $0x20c] ss:$16 sps:$4 sm:$0xff]  }
  0x88   :  { %v3187_v11 = vld [vmem:[#allocation5 + $0x220] ss:$16 sps:$4 sm:$0xff]   ;;  %v3190_v12 = vld [vmem:[#allocation5 + $0x208] ss:$16 sps:$4 sm:$0xff]   ;;  %v3195_v13 = vld [vmem:[#allocation5 + $0x244] ss:$16 sps:$4 sm:$0xff]  }
  0x89   :  { %1380 = vmatpush1.bf16.msra.mxu0 %v3123_v29  ;;  %v3198_v14 = vld [vmem:[#allocation5 + $0x22c] ss:$16 sps:$4 sm:$0xff]   ;;  %v3193_v15 = vld [vmem:[#allocation5 + $0x240] ss:$16 sps:$4 sm:$0xff]   ;;  %v3196_v16 = vld [vmem:[#allocation5 + $0x228] ss:$16 sps:$4 sm:$0xff]  }
  0x8a   :  { %1550 = vmatpush1.bf16.msra.mxu1 %v3120_v28  ;;  %1381 = vmatprep.subr.bf16.mxu0 %v3124_v30  ;;  %v3201_v17 = vld [vmem:[#allocation5 + $0x264] ss:$16 sps:$4 sm:$0xff]   ;;  %v3204_v18 = vld [vmem:[#allocation5 + $0x24c] ss:$16 sps:$4 sm:$0xff]   ;;  %v3199_v19 = vld [vmem:[#allocation5 + $0x260] ss:$16 sps:$4 sm:$0xff]  }
  0x8b   :  { %1551 = vmatprep.subr.bf16.mxu1 %v3128_v31  ;;  %v3202_v20 = vld [vmem:[#allocation5 + $0x248] ss:$16 sps:$4 sm:$0xff]   ;;  %v3207_v21 = vld [vmem:[#allocation5 + $0x284] ss:$16 sps:$4 sm:$0xff]   ;;  %v3210_v22 = vld [vmem:[#allocation5 + $0x26c] ss:$16 sps:$4 sm:$0xff]  }
  0x8c   :  { %v3205_v23 = vld [vmem:[#allocation5 + $0x280] ss:$16 sps:$4 sm:$0xff]   ;;  %v3208_v24 = vld [vmem:[#allocation5 + $0x268] ss:$16 sps:$4 sm:$0xff]   ;;  %v3213_v25 = vld [vmem:[#allocation5 + $0x2a4] ss:$16 sps:$4 sm:$0xff]  }
  0x8d   :  { %1382 = vmatpush1.bf16.msra.mxu0 %v3129_v32  ;;  %v3216_v26 = vld [vmem:[#allocation5 + $0x28c] ss:$16 sps:$4 sm:$0xff]   ;;  %v3211_v27 = vld [vmem:[#allocation5 + $0x2a0] ss:$16 sps:$4 sm:$0xff]   ;;  %v3214_v28 = vld [vmem:[#allocation5 + $0x288] ss:$16 sps:$4 sm:$0xff]  }
  0x8e   :  { %1552 = vmatpush1.bf16.msra.mxu1 %v3126_v33  ;;  %1383 = vmatprep.subr.bf16.mxu0 %v3130_v34  ;;  %v3219_v29 = vld [vmem:[#allocation5 + $0x2c4] ss:$16 sps:$4 sm:$0xff]   ;;  %v3222_v30 = vld [vmem:[#allocation5 + $0x2ac] ss:$16 sps:$4 sm:$0xff]   ;;  %v3217_v31 = vld [vmem:[#allocation5 + $0x2c0] ss:$16 sps:$4 sm:$0xff]  }
  0x8f   :  { %1553 = vmatprep.subr.bf16.mxu1 %v3134_v35  ;;  %v3220_v32 = vld [vmem:[#allocation5 + $0x2a8] ss:$16 sps:$4 sm:$0xff]   ;;  %v3279_v33 = vld [vmem:[#allocation2 + $0xc] ss:$28 sps:$4 sm:$0xff]   ;;  %v3228_v35 = vld [vmem:[#allocation5 + $0x2cc] ss:$16 sps:$4 sm:$0xff]  }
  0x90   :  { %v3225_v34 = vld [vmem:[#allocation5 + $0x2e4] ss:$16 sps:$4 sm:$0xff]   ;;  %vm3694_vm1 = vmmov 0   ;;  %s3695_s23 = smov [#allocation13]  }
  0x91   :  { %1384 = vmatpush1.bf16.msra.mxu0 %v3135_v37  ;;  %v3226_v37 = vld [vmem:[#allocation5 + $0x2c8] ss:$16 sps:$4 sm:$0xff]   ;;  %v3249_v50 = vld [vmem:[#allocation5 + $0x364] ss:$16 sps:$4 sm:$0xff]   ;;  %s2624_s24 = sshll.u32 %s3695_s23, 4  ;;  %s2625_s24 = int_to_ptr.vmem [resolvable:$true] %s2624_s24 }
  0x92   :  { %1554 = vmatpush1.bf16.msra.mxu1 %v3132_v36  ;;  %1385 = vmatprep.subr.bf16.mxu0 %v3136_v38  ;;  %v3223_v36 = vld [vmem:[#allocation5 + $0x2e0] ss:$16 sps:$4 sm:$0xff]   ;;  %v3231_v38 = vld [vmem:[#allocation5 + $0x304] ss:$16 sps:$4 sm:$0xff]   ;;  %p3651_p7 = scmp.lt.s32.totalorder %s2625_s24, %s2625_s24 }
  0x93   :  { %1555 = vmatprep.subr.bf16.mxu1 %v3140_v39  ;;  %v3234_v39 = vld [vmem:[#allocation5 + $0x2ec] ss:$16 sps:$4 sm:$0xff]  }
  0x95   :  { %1386 = vmatpush1.bf16.msra.mxu0 %v3141_v40  ;;  %v3229_v40 = vld [vmem:[#allocation5 + $0x300] ss:$16 sps:$4 sm:$0xff]  }
  0x96   :  { %1556 = vmatpush1.bf16.msra.mxu1 %v3138_v41  ;;  %1387 = vmatprep.subr.bf16.mxu0 %v3142_v42  ;;  %v3232_v41 = vld [vmem:[#allocation5 + $0x2e8] ss:$16 sps:$4 sm:$0xff]   ;;  %v3237_v42 = vld [vmem:[#allocation5 + $0x324] ss:$16 sps:$4 sm:$0xff]  }
  0x97   :  { %1557 = vmatprep.subr.bf16.mxu1 %v3146_v43  ;;  %v3240_v43 = vld [vmem:[#allocation5 + $0x30c] ss:$16 sps:$4 sm:$0xff]  }
  0x99   :  { %1388 = vmatpush1.bf16.msra.mxu0 %v3147_v45  ;;  %v3238_v45 = vld [vmem:[#allocation5 + $0x308] ss:$16 sps:$4 sm:$0xff]  }
  0x9a   :  { %1558 = vmatpush1.bf16.msra.mxu1 %v3144_v44  ;;  %1389 = vmatprep.subr.bf16.mxu0 %v3148_v46  ;;  %v3235_v44 = vld [vmem:[#allocation5 + $0x320] ss:$16 sps:$4 sm:$0xff]   ;;  %v3243_v46 = vld [vmem:[#allocation5 + $0x344] ss:$16 sps:$4 sm:$0xff]  }
  0x9b   :  { %1559 = vmatprep.subr.bf16.mxu1 %v3152_v47  ;;  %v3246_v47 = vld [vmem:[#allocation5 + $0x32c] ss:$16 sps:$4 sm:$0xff]  }
  0x9d   :  { %1390 = vmatpush1.bf16.msra.mxu0 %v3153_v49  ;;  %v3244_v49 = vld [vmem:[#allocation5 + $0x328] ss:$16 sps:$4 sm:$0xff]  }
  0x9e   :  { %1560 = vmatpush1.bf16.msra.mxu1 %v3150_v48  ;;  %1391 = vmatprep.subr.bf16.mxu0 %v3154_v51  ;;  %v3241_v48 = vld [vmem:[#allocation5 + $0x340] ss:$16 sps:$4 sm:$0xff]   ;;  %v3252_v51 = vld [vmem:[#allocation5 + $0x34c] ss:$16 sps:$4 sm:$0xff]  }
  0x9f   :  { %1561 = vmatprep.subr.bf16.mxu1 %v3158_v52  ;;  %v3247_v52 = vld [vmem:[#allocation5 + $0x360] ss:$16 sps:$4 sm:$0xff]  }
  0xa1   :  { %1392 = vmatpush1.bf16.msra.mxu0 %v3159_v54  ;;  %v3255_v54 = vld [vmem:[#allocation5 + $0x384] ss:$16 sps:$4 sm:$0xff]  }
  0xa2   :  { %1562 = vmatpush1.bf16.msra.mxu1 %v3156_v53  ;;  %1393 = vmatprep.subr.bf16.mxu0 %v3160_v55  ;;  %v3250_v53 = vld [vmem:[#allocation5 + $0x348] ss:$16 sps:$4 sm:$0xff]   ;;  %v3258_v55 = vld [vmem:[#allocation5 + $0x36c] ss:$16 sps:$4 sm:$0xff]  }
  0xa3   :  { %1563 = vmatprep.subr.bf16.mxu1 %v3164_v56  ;;  %v3253_v56 = vld [vmem:[#allocation5 + $0x380] ss:$16 sps:$4 sm:$0xff]  }
  0xa5   :  { %1394 = vmatpush1.bf16.msra.mxu0 %v3165_v58  ;;  %v3261_v58 = vld [vmem:[#allocation5 + $0x3a4] ss:$16 sps:$4 sm:$0xff]  }
  0xa6   :  { %1564 = vmatpush1.bf16.msra.mxu1 %v3162_v57  ;;  %1395 = vmatprep.subr.bf16.mxu0 %v3166_v59  ;;  %v3256_v57 = vld [vmem:[#allocation5 + $0x368] ss:$16 sps:$4 sm:$0xff]   ;;  %v3264_v59 = vld [vmem:[#allocation5 + $0x38c] ss:$16 sps:$4 sm:$0xff]  }
  0xa7   :  { %1565 = vmatprep.subr.bf16.mxu1 %v3170_v60  ;;  %v3259_v60 = vld [vmem:[#allocation5 + $0x3a0] ss:$16 sps:$4 sm:$0xff]  }
  0xa9   :  { %1396 = vmatpush1.bf16.msra.mxu0 %v3171_v62  ;;  %v3267_v62 = vld [vmem:[#allocation5 + $0x3c4] ss:$16 sps:$4 sm:$0xff]  }
  0xaa   :  { %1566 = vmatpush1.bf16.msra.mxu1 %v3168_v61  ;;  %1397 = vmatprep.subr.bf16.mxu0 %v3172_v63  ;;  %v3262_v61 = vld [vmem:[#allocation5 + $0x388] ss:$16 sps:$4 sm:$0xff]   ;;  %v3270_v63 = vld [vmem:[#allocation5 + $0x3ac] ss:$16 sps:$4 sm:$0xff]  }
  0xab   :  { %1567 = vmatprep.subr.bf16.mxu1 %v3176_v1  ;;  %v3265_v1 = vld [vmem:[#allocation5 + $0x3c0] ss:$16 sps:$4 sm:$0xff]  }
  0xad   :  { %1398 = vmatpush1.bf16.msra.mxu0 %v3177_v3  ;;  %v3273_v3 = vld [vmem:[#allocation5 + $0x3e4] ss:$16 sps:$4 sm:$0xff]  }
  0xae   :  { %1568 = vmatpush1.bf16.msra.mxu1 %v3174_v2  ;;  %1410 = vmatprep.subr.bf16.mxu0 %v3183_v4  ;;  %v3268_v2 = vld [vmem:[#allocation5 + $0x3a8] ss:$16 sps:$4 sm:$0xff]   ;;  %v3276_v4 = vld [vmem:[#allocation5 + $0x3cc] ss:$16 sps:$4 sm:$0xff]  }
  0xaf   :  { %1569 = vmatprep.subr.bf16.mxu1 %v3186_v5  ;;  %v3271_v5 = vld [vmem:[#allocation5 + $0x3e0] ss:$16 sps:$4 sm:$0xff]  }
  0xb0   :  { %1400 = vmatmul.mubr.bf16.vlgmr.msra.gmra.mrb[0].mxu0 %v3178_v6 }
  0xb1   :  { %1411 = vmatpush1.bf16.msra.mxu0 %v3181_v7  ;;  %1442 = vmatprep.mubr.bf16.mxu0 %v3279_v33  ;;  %v3282_v7 = vld [vmem:[#allocation5 + $0x404] ss:$16 sps:$4 sm:$0xff]  }
  0xb2   :  { %1570 = vmatpush1.bf16.msra.mxu1 %v3184_v8  ;;  %1412 = vmatprep.subr.bf16.mxu0 %v3189_v9  ;;  %v3285_v8 = vld [vmem:[#allocation5 + $0x3ec] ss:$16 sps:$4 sm:$0xff]  }
  0xb3   :  { %1582 = vmatprep.subr.bf16.mxu1 %v3192_v10  ;;  %v3277_v9 = vld [vmem:[#allocation2 + $0x8] ss:$28 sps:$4 sm:$0xff]  }
  0xb4   :  { %v3280_v10 = vld [vmem:[#allocation5 + $0x400] ss:$16 sps:$4 sm:$0xff]  }
  0xb5   :  { %1413 = vmatpush1.bf16.msra.mxu0 %v3187_v11  ;;  %1572 = vmatmul.mubr.bf16.vlgmr.msra.gmra.mrb[4].mxu1 %v3178_v6  ;;  %v3274_v6 = vld [vmem:[#allocation5 + $0x3c8] ss:$16 sps:$4 sm:$0xff]  }
  0xb6   :  { %1583 = vmatpush1.bf16.msra.mxu1 %v3190_v12  ;;  %1414 = vmatprep.subr.bf16.mxu0 %v3195_v13  ;;  %v3283_v11 = vld [vmem:[#allocation5 + $0x3e8] ss:$16 sps:$4 sm:$0xff]   ;;  %v3288_v12 = vld [vmem:[#allocation5 + $0x424] ss:$16 sps:$4 sm:$0xff]   ;;  %v3291_v13 = vld [vmem:[#allocation5 + $0x40c] ss:$16 sps:$4 sm:$0xff]  }
  0xb7   :  { %1584 = vmatprep.subr.bf16.mxu1 %v3198_v14  ;;  %1614 = vmatprep.mubr.bf16.mxu1 %v3279_v33  ;;  %v3286_v14 = vld [vmem:[#allocation5 + $0x420] ss:$16 sps:$4 sm:$0xff]   ;;  %v3318_v33 = vld [vmem:[#allocation5 + $0x4c4] ss:$16 sps:$4 sm:$0xff]  }
  0xb9   :  { %1415 = vmatpush1.bf16.msra.mxu0 %v3193_v15  ;;  %v3289_v15 = vld [vmem:[#allocation5 + $0x408] ss:$16 sps:$4 sm:$0xff]  }
  0xba   :  { %1585 = vmatpush1.bf16.msra.mxu1 %v3196_v16  ;;  %1416 = vmatprep.subr.bf16.mxu0 %v3201_v17  ;;  %v3378_v16 = vld [vmem:[#allocation2 + $0x14] ss:$28 sps:$4 sm:$0xff]   ;;  %v3294_v17 = vld [vmem:[#allocation5 + $0x444] ss:$16 sps:$4 sm:$0xff]  }
  0xbb   :  { %1586 = vmatprep.subr.bf16.mxu1 %v3204_v18  ;;  %v3297_v18 = vld [vmem:[#allocation5 + $0x42c] ss:$16 sps:$4 sm:$0xff]  }
  0xbd   :  { %1417 = vmatpush1.bf16.msra.mxu0 %v3199_v19  ;;  %v3292_v19 = vld [vmem:[#allocation5 + $0x440] ss:$16 sps:$4 sm:$0xff]  }
  0xbe   :  { %1587 = vmatpush1.bf16.msra.mxu1 %v3202_v20  ;;  %1418 = vmatprep.subr.bf16.mxu0 %v3207_v21  ;;  %v3295_v20 = vld [vmem:[#allocation5 + $0x428] ss:$16 sps:$4 sm:$0xff]   ;;  %v3300_v21 = vld [vmem:[#allocation5 + $0x464] ss:$16 sps:$4 sm:$0xff]  }
  0xbf   :  { %1588 = vmatprep.subr.bf16.mxu1 %v3210_v22  ;;  %v3303_v22 = vld [vmem:[#allocation5 + $0x44c] ss:$16 sps:$4 sm:$0xff]  }
  0xc1   :  { %1419 = vmatpush1.bf16.msra.mxu0 %v3205_v23  ;;  %v3298_v23 = vld [vmem:[#allocation5 + $0x460] ss:$16 sps:$4 sm:$0xff]  }
  0xc2   :  { %1589 = vmatpush1.bf16.msra.mxu1 %v3208_v24  ;;  %1420 = vmatprep.subr.bf16.mxu0 %v3213_v25  ;;  %v3301_v24 = vld [vmem:[#allocation5 + $0x448] ss:$16 sps:$4 sm:$0xff]   ;;  %v3306_v25 = vld [vmem:[#allocation5 + $0x484] ss:$16 sps:$4 sm:$0xff]  }
  0xc3   :  { %1590 = vmatprep.subr.bf16.mxu1 %v3216_v26  ;;  %v3309_v26 = vld [vmem:[#allocation5 + $0x46c] ss:$16 sps:$4 sm:$0xff]  }
  0xc5   :  { %1421 = vmatpush1.bf16.msra.mxu0 %v3211_v27  ;;  %v3304_v27 = vld [vmem:[#allocation5 + $0x480] ss:$16 sps:$4 sm:$0xff]  }
  0xc6   :  { %1591 = vmatpush1.bf16.msra.mxu1 %v3214_v28  ;;  %1422 = vmatprep.subr.bf16.mxu0 %v3219_v29  ;;  %v3307_v28 = vld [vmem:[#allocation5 + $0x468] ss:$16 sps:$4 sm:$0xff]   ;;  %v3312_v29 = vld [vmem:[#allocation5 + $0x4a4] ss:$16 sps:$4 sm:$0xff]  }
  0xc7   :  { %1592 = vmatprep.subr.bf16.mxu1 %v3222_v30  ;;  %v3315_v30 = vld [vmem:[#allocation5 + $0x48c] ss:$16 sps:$4 sm:$0xff]  }
  0xc9   :  { %1423 = vmatpush1.bf16.msra.mxu0 %v3217_v31  ;;  %v3310_v31 = vld [vmem:[#allocation5 + $0x4a0] ss:$16 sps:$4 sm:$0xff]  }
  0xca   :  { %1593 = vmatpush1.bf16.msra.mxu1 %v3220_v32  ;;  %1424 = vmatprep.subr.bf16.mxu0 %v3225_v34  ;;  %v3313_v32 = vld [vmem:[#allocation5 + $0x488] ss:$16 sps:$4 sm:$0xff]   ;;  %v3321_v34 = vld [vmem:[#allocation5 + $0x4ac] ss:$16 sps:$4 sm:$0xff]  }
  0xcb   :  { %1594 = vmatprep.subr.bf16.mxu1 %v3228_v35  ;;  %v3316_v35 = vld [vmem:[#allocation5 + $0x4c0] ss:$16 sps:$4 sm:$0xff]  }
  0xcd   :  { %1425 = vmatpush1.bf16.msra.mxu0 %v3223_v36  ;;  %v3319_v36 = vld [vmem:[#allocation5 + $0x4a8] ss:$16 sps:$4 sm:$0xff]  }
  0xce   :  { %1595 = vmatpush1.bf16.msra.mxu1 %v3226_v37  ;;  %1426 = vmatprep.subr.bf16.mxu0 %v3231_v38  ;;  %v3324_v37 = vld [vmem:[#allocation5 + $0x4e4] ss:$16 sps:$4 sm:$0xff]   ;;  %v3327_v38 = vld [vmem:[#allocation5 + $0x4cc] ss:$16 sps:$4 sm:$0xff]  }
  0xcf   :  { %1596 = vmatprep.subr.bf16.mxu1 %v3234_v39  ;;  %v3322_v39 = vld [vmem:[#allocation5 + $0x4e0] ss:$16 sps:$4 sm:$0xff]  }
  0xd1   :  { %1427 = vmatpush1.bf16.msra.mxu0 %v3229_v40  ;;  %v3325_v40 = vld [vmem:[#allocation5 + $0x4c8] ss:$16 sps:$4 sm:$0xff]  }
  0xd2   :  { %1597 = vmatpush1.bf16.msra.mxu1 %v3232_v41  ;;  %1428 = vmatprep.subr.bf16.mxu0 %v3237_v42  ;;  %v3330_v41 = vld [vmem:[#allocation5 + $0x504] ss:$16 sps:$4 sm:$0xff]   ;;  %v3333_v42 = vld [vmem:[#allocation5 + $0x4ec] ss:$16 sps:$4 sm:$0xff]  }
  0xd3   :  { %1598 = vmatprep.subr.bf16.mxu1 %v3240_v43  ;;  %v3328_v43 = vld [vmem:[#allocation5 + $0x500] ss:$16 sps:$4 sm:$0xff]  }
  0xd5   :  { %1429 = vmatpush1.bf16.msra.mxu0 %v3235_v44  ;;  %v3331_v44 = vld [vmem:[#allocation5 + $0x4e8] ss:$16 sps:$4 sm:$0xff]  }
  0xd6   :  { %1599 = vmatpush1.bf16.msra.mxu1 %v3238_v45  ;;  %1430 = vmatprep.subr.bf16.mxu0 %v3243_v46  ;;  %v3336_v45 = vld [vmem:[#allocation5 + $0x524] ss:$16 sps:$4 sm:$0xff]   ;;  %v3339_v46 = vld [vmem:[#allocation5 + $0x50c] ss:$16 sps:$4 sm:$0xff]  }
  0xd7   :  { %1600 = vmatprep.subr.bf16.mxu1 %v3246_v47  ;;  %v3334_v47 = vld [vmem:[#allocation5 + $0x520] ss:$16 sps:$4 sm:$0xff]  }
  0xd9   :  { %1431 = vmatpush1.bf16.msra.mxu0 %v3241_v48  ;;  %v3337_v48 = vld [vmem:[#allocation5 + $0x508] ss:$16 sps:$4 sm:$0xff]  }
  0xda   :  { %1601 = vmatpush1.bf16.msra.mxu1 %v3244_v49  ;;  %1432 = vmatprep.subr.bf16.mxu0 %v3249_v50  ;;  %v3342_v49 = vld [vmem:[#allocation5 + $0x544] ss:$16 sps:$4 sm:$0xff]   ;;  %v3345_v50 = vld [vmem:[#allocation5 + $0x52c] ss:$16 sps:$4 sm:$0xff]  }
  0xdb   :  { %1602 = vmatprep.subr.bf16.mxu1 %v3252_v51  ;;  %v3340_v51 = vld [vmem:[#allocation5 + $0x540] ss:$16 sps:$4 sm:$0xff]  }
  0xdd   :  { %1433 = vmatpush1.bf16.msra.mxu0 %v3247_v52  ;;  %v3343_v52 = vld [vmem:[#allocation5 + $0x528] ss:$16 sps:$4 sm:$0xff]  }
  0xde   :  { %1603 = vmatpush1.bf16.msra.mxu1 %v3250_v53  ;;  %1434 = vmatprep.subr.bf16.mxu0 %v3255_v54  ;;  %v3348_v53 = vld [vmem:[#allocation5 + $0x564] ss:$16 sps:$4 sm:$0xff]   ;;  %v3351_v54 = vld [vmem:[#allocation5 + $0x54c] ss:$16 sps:$4 sm:$0xff]  }
  0xdf   :  { %1604 = vmatprep.subr.bf16.mxu1 %v3258_v55  ;;  %v3346_v55 = vld [vmem:[#allocation5 + $0x560] ss:$16 sps:$4 sm:$0xff]  }
  0xe1   :  { %1435 = vmatpush1.bf16.msra.mxu0 %v3253_v56  ;;  %v3349_v56 = vld [vmem:[#allocation5 + $0x548] ss:$16 sps:$4 sm:$0xff]  }
  0xe2   :  { %1605 = vmatpush1.bf16.msra.mxu1 %v3256_v57  ;;  %1436 = vmatprep.subr.bf16.mxu0 %v3261_v58  ;;  %v3354_v57 = vld [vmem:[#allocation5 + $0x584] ss:$16 sps:$4 sm:$0xff]   ;;  %v3357_v58 = vld [vmem:[#allocation5 + $0x56c] ss:$16 sps:$4 sm:$0xff]  }
  0xe3   :  { %1606 = vmatprep.subr.bf16.mxu1 %v3264_v59  ;;  %v3352_v59 = vld [vmem:[#allocation5 + $0x580] ss:$16 sps:$4 sm:$0xff]  }
  0xe5   :  { %1437 = vmatpush1.bf16.msra.mxu0 %v3259_v60  ;;  %v3355_v60 = vld [vmem:[#allocation5 + $0x568] ss:$16 sps:$4 sm:$0xff]  }
  0xe6   :  { %1607 = vmatpush1.bf16.msra.mxu1 %v3262_v61  ;;  %1438 = vmatprep.subr.bf16.mxu0 %v3267_v62  ;;  %v3360_v61 = vld [vmem:[#allocation5 + $0x5a4] ss:$16 sps:$4 sm:$0xff]   ;;  %v3363_v62 = vld [vmem:[#allocation5 + $0x58c] ss:$16 sps:$4 sm:$0xff]  }
  0xe7   :  { %1608 = vmatprep.subr.bf16.mxu1 %v3270_v63  ;;  %v3358_v63 = vld [vmem:[#allocation5 + $0x5a0] ss:$16 sps:$4 sm:$0xff]  }
  0xe9   :  { %1439 = vmatpush1.bf16.msra.mxu0 %v3265_v1  ;;  %v3361_v1 = vld [vmem:[#allocation5 + $0x588] ss:$16 sps:$4 sm:$0xff]  }
  0xea   :  { %1609 = vmatpush1.bf16.msra.mxu1 %v3268_v2  ;;  %1440 = vmatprep.subr.bf16.mxu0 %v3273_v3  ;;  %v3366_v2 = vld [vmem:[#allocation5 + $0x5c4] ss:$16 sps:$4 sm:$0xff]   ;;  %v3369_v3 = vld [vmem:[#allocation5 + $0x5ac] ss:$16 sps:$4 sm:$0xff]  }
  0xeb   :  { %1610 = vmatprep.subr.bf16.mxu1 %v3276_v4  ;;  %v3364_v4 = vld [vmem:[#allocation5 + $0x5c0] ss:$16 sps:$4 sm:$0xff]  }
  0xed   :  { %1441 = vmatpush1.bf16.msra.mxu0 %v3271_v5  ;;  %v3367_v5 = vld [vmem:[#allocation5 + $0x5a8] ss:$16 sps:$4 sm:$0xff]  }
  0xee   :  { %1611 = vmatpush1.bf16.msra.mxu1 %v3274_v6  ;;  %1453 = vmatprep.subr.bf16.mxu0 %v3282_v7  ;;  %v3372_v6 = vld [vmem:[#allocation5 + $0x5e4] ss:$16 sps:$4 sm:$0xff]   ;;  %v3375_v7 = vld [vmem:[#allocation5 + $0x5cc] ss:$16 sps:$4 sm:$0xff]  }
  0xef   :  { %1612 = vmatprep.subr.bf16.mxu1 %v3285_v8  ;;  %v3370_v8 = vld [vmem:[#allocation5 + $0x5e0] ss:$16 sps:$4 sm:$0xff]  }
  0xf0   :  { %1443 = vmatmul.mubr.bf16.vlgmr.msra.gmra.mrb[0].mxu0 %v3277_v9 }
  0xf1   :  { %1454 = vmatpush1.bf16.msra.mxu0 %v3280_v10  ;;  %1485 = vmatprep.mubr.bf16.mxu0 %v3378_v16  ;;  %v3387_v10 = vld [vmem:[#allocation7 + $0x4] ss:$8 sps:$4 sm:$0xff]  }
  0xf2   :  { %1613 = vmatpush1.bf16.msra.mxu1 %v3283_v11  ;;  %1455 = vmatprep.subr.bf16.mxu0 %v3288_v12  ;;  %v3381_v11 = vld [vmem:[#allocation5 + $0x5ec] ss:$16 sps:$4 sm:$0xff]   ;;  %v3376_v12 = vld [vmem:[#allocation2 + $0x10] ss:$28 sps:$4 sm:$0xff]  }
  0xf3   :  { %1625 = vmatprep.subr.bf16.mxu1 %v3291_v13  ;;  %v3385_v13 = vld [vmem:[#allocation7] ss:$8 sps:$4 sm:$0xff]  }
  0xf5   :  { %1456 = vmatpush1.bf16.msra.mxu0 %v3286_v14  ;;  %1615 = vmatmul.mubr.bf16.vlgmr.msra.gmra.mrb[4].mxu1 %v3277_v9  ;;  %v3373_v9 = vld [vmem:[#allocation5 + $0x5c8] ss:$16 sps:$4 sm:$0xff]  }
  0xf6   :  { %1626 = vmatpush1.bf16.msra.mxu1 %v3289_v15  ;;  %1457 = vmatprep.subr.bf16.mxu0 %v3294_v17  ;;  %v3379_v14 = vld [vmem:[#allocation5 + $0x5e8] ss:$16 sps:$4 sm:$0xff]   ;;  %v3390_v15 = vld [vmem:[#allocation7 + $0x14] ss:$8 sps:$4 sm:$0xff]  }
  0xf7   :  { %1627 = vmatprep.subr.bf16.mxu1 %v3297_v18  ;;  %1657 = vmatprep.mubr.bf16.mxu1 %v3378_v16  ;;  %v3384_v16 = vld [vmem:[#allocation5 + $0x60c] ss:$16 sps:$4 sm:$0xff]   ;;  %v3388_v17 = vld [vmem:[#allocation7 + $0x10] ss:$8 sps:$4 sm:$0xff]  }
  0xf8   :  { %v3382_v18 = vld [vmem:[#allocation5 + $0x608] ss:$16 sps:$4 sm:$0xff]  }
  0xf9   :  { %1458 = vmatpush1.bf16.msra.mxu0 %v3292_v19  ;;  %v3393_v19 = vld [vmem:[#allocation7 + $0x24] ss:$8 sps:$4 sm:$0xff]  }
  0xfa   :  { %1628 = vmatpush1.bf16.msra.mxu1 %v3295_v20  ;;  %1459 = vmatprep.subr.bf16.mxu0 %v3300_v21  ;;  %v3391_v20 = vld [vmem:[#allocation7 + $0x20] ss:$8 sps:$4 sm:$0xff]   ;;  %v3396_v21 = vld [vmem:[#allocation7 + $0x34] ss:$8 sps:$4 sm:$0xff]  }
  0xfb   :  { %1629 = vmatprep.subr.bf16.mxu1 %v3303_v22  ;;  %v3394_v22 = vld [vmem:[#allocation7 + $0x30] ss:$8 sps:$4 sm:$0xff]  }
  0xfd   :  { %1460 = vmatpush1.bf16.msra.mxu0 %v3298_v23  ;;  %v3399_v23 = vld [vmem:[#allocation7 + $0x44] ss:$8 sps:$4 sm:$0xff]  }
  0xfe   :  { %1630 = vmatpush1.bf16.msra.mxu1 %v3301_v24  ;;  %1461 = vmatprep.subr.bf16.mxu0 %v3306_v25  ;;  %v3397_v24 = vld [vmem:[#allocation7 + $0x40] ss:$8 sps:$4 sm:$0xff]   ;;  %v3402_v25 = vld [vmem:[#allocation7 + $0x54] ss:$8 sps:$4 sm:$0xff]  }
  0xff   :  { %1631 = vmatprep.subr.bf16.mxu1 %v3309_v26  ;;  %v3513_v26 = vld [vmem:[#allocation2 + $0x18] ss:$28 sps:$4 sm:$0xff]  }
 0x101   :  { %1462 = vmatpush1.bf16.msra.mxu0 %v3304_v27  ;;  %v3400_v27 = vld [vmem:[#allocation7 + $0x50] ss:$8 sps:$4 sm:$0xff]  }
 0x102   :  { %1632 = vmatpush1.bf16.msra.mxu1 %v3307_v28  ;;  %1463 = vmatprep.subr.bf16.mxu0 %v3312_v29  ;;  %v3405_v28 = vld [vmem:[#allocation7 + $0x64] ss:$8 sps:$4 sm:$0xff]   ;;  %v3403_v29 = vld [vmem:[#allocation7 + $0x60] ss:$8 sps:$4 sm:$0xff]  }
 0x103   :  { %1633 = vmatprep.subr.bf16.mxu1 %v3315_v30 }
 0x105   :  { %1464 = vmatpush1.bf16.msra.mxu0 %v3310_v31 }
 0x106   :  { %1634 = vmatpush1.bf16.msra.mxu1 %v3313_v32  ;;  %1465 = vmatprep.subr.bf16.mxu0 %v3318_v33  ;;  %v3406_v32 = vld [vmem:[#allocation7 + $0x70] ss:$8 sps:$4 sm:$0xff]  }
 0x107   :  { %1635 = vmatprep.subr.bf16.mxu1 %v3321_v34  ;;  %v3411_v34 = vld [vmem:[#allocation7 + $0x84] ss:$8 sps:$4 sm:$0xff]  }
 0x109   :  { %1466 = vmatpush1.bf16.msra.mxu0 %v3316_v35 }
 0x10a   :  { %1636 = vmatpush1.bf16.msra.mxu1 %v3319_v36  ;;  %1467 = vmatprep.subr.bf16.mxu0 %v3324_v37  ;;  %v3409_v36 = vld [vmem:[#allocation7 + $0x80] ss:$8 sps:$4 sm:$0xff]   ;;  %v3414_v37 = vld [vmem:[#allocation7 + $0x94] ss:$8 sps:$4 sm:$0xff]  }
 0x10b   :  { %1637 = vmatprep.subr.bf16.mxu1 %v3327_v38  ;;  %v3412_v38 = vld [vmem:[#allocation7 + $0x90] ss:$8 sps:$4 sm:$0xff]  }
 0x10d   :  { %1468 = vmatpush1.bf16.msra.mxu0 %v3322_v39  ;;  %v3417_v39 = vld [vmem:[#allocation7 + $0xa4] ss:$8 sps:$4 sm:$0xff]  }
 0x10e   :  { %1638 = vmatpush1.bf16.msra.mxu1 %v3325_v40  ;;  %1469 = vmatprep.subr.bf16.mxu0 %v3330_v41  ;;  %v3415_v40 = vld [vmem:[#allocation7 + $0xa0] ss:$8 sps:$4 sm:$0xff]   ;;  %v3420_v41 = vld [vmem:[#allocation7 + $0xb4] ss:$8 sps:$4 sm:$0xff]  }
 0x10f   :  { %1639 = vmatprep.subr.bf16.mxu1 %v3333_v42  ;;  %v3418_v42 = vld [vmem:[#allocation7 + $0xb0] ss:$8 sps:$4 sm:$0xff]  }
 0x111   :  { %1470 = vmatpush1.bf16.msra.mxu0 %v3328_v43  ;;  %v3423_v43 = vld [vmem:[#allocation7 + $0xc4] ss:$8 sps:$4 sm:$0xff]  }
 0x112   :  { %1640 = vmatpush1.bf16.msra.mxu1 %v3331_v44  ;;  %1471 = vmatprep.subr.bf16.mxu0 %v3336_v45  ;;  %v3421_v44 = vld [vmem:[#allocation7 + $0xc0] ss:$8 sps:$4 sm:$0xff]   ;;  %v3426_v45 = vld [vmem:[#allocation7 + $0xd4] ss:$8 sps:$4 sm:$0xff]  }
 0x113   :  { %1641 = vmatprep.subr.bf16.mxu1 %v3339_v46  ;;  %v3424_v46 = vld [vmem:[#allocation7 + $0xd0] ss:$8 sps:$4 sm:$0xff]  }
 0x115   :  { %1472 = vmatpush1.bf16.msra.mxu0 %v3334_v47  ;;  %v3429_v47 = vld [vmem:[#allocation7 + $0xe4] ss:$8 sps:$4 sm:$0xff]  }
 0x116   :  { %1642 = vmatpush1.bf16.msra.mxu1 %v3337_v48  ;;  %1473 = vmatprep.subr.bf16.mxu0 %v3342_v49  ;;  %v3427_v48 = vld [vmem:[#allocation7 + $0xe0] ss:$8 sps:$4 sm:$0xff]   ;;  %v3432_v49 = vld [vmem:[#allocation7 + $0xf4] ss:$8 sps:$4 sm:$0xff]  }
 0x117   :  { %1643 = vmatprep.subr.bf16.mxu1 %v3345_v50  ;;  %v3430_v50 = vld [vmem:[#allocation7 + $0xf0] ss:$8 sps:$4 sm:$0xff]  }
 0x119   :  { %1474 = vmatpush1.bf16.msra.mxu0 %v3340_v51  ;;  %v3435_v51 = vld [vmem:[#allocation7 + $0x104] ss:$8 sps:$4 sm:$0xff]  }
 0x11a   :  { %1644 = vmatpush1.bf16.msra.mxu1 %v3343_v52  ;;  %1475 = vmatprep.subr.bf16.mxu0 %v3348_v53  ;;  %v3481_v52 = vld [vmem:[#allocation8 + $0x40] sm:$0xff]  }
 0x11b   :  { %1645 = vmatprep.subr.bf16.mxu1 %v3351_v54  ;;  %v3482_v53 = vld [vmem:[#allocation8] sm:$0xff]   ;;  %v3483_v54 = vld [vmem:[#allocation8 + $0x48] sm:$0xff]  }
 0x11d   :  { %1476 = vmatpush1.bf16.msra.mxu0 %v3346_v55  ;;  %v3484_v55 = vld [vmem:[#allocation8 + $0x8] sm:$0xff]  }
 0x11e   :  { %1646 = vmatpush1.bf16.msra.mxu1 %v3349_v56  ;;  %1477 = vmatprep.subr.bf16.mxu0 %v3354_v57  ;;  %v3485_v56 = vld [vmem:[#allocation8 + $0x50] sm:$0xff]  }
 0x11f   :  { %1647 = vmatprep.subr.bf16.mxu1 %v3357_v58  ;;  %v3486_v57 = vld [vmem:[#allocation8 + $0x10] sm:$0xff]   ;;  %v3487_v58 = vld [vmem:[#allocation8 + $0x58] sm:$0xff]  }
 0x121   :  { %1478 = vmatpush1.bf16.msra.mxu0 %v3352_v59  ;;  %v3488_v59 = vld [vmem:[#allocation8 + $0x18] sm:$0xff]  }
 0x122   :  { %1648 = vmatpush1.bf16.msra.mxu1 %v3355_v60  ;;  %1479 = vmatprep.subr.bf16.mxu0 %v3360_v61  ;;  %v3489_v60 = vld [vmem:[#allocation8 + $0x60] sm:$0xff]  }
 0x123   :  { %1649 = vmatprep.subr.bf16.mxu1 %v3363_v62  ;;  %v3490_v61 = vld [vmem:[#allocation8 + $0x20] sm:$0xff]   ;;  %v3491_v62 = vld [vmem:[#allocation8 + $0x68] sm:$0xff]  }
 0x125   :  { %1480 = vmatpush1.bf16.msra.mxu0 %v3358_v63  ;;  %v328_v63 = vlaneseq }
 0x126   :  { %1650 = vmatpush1.bf16.msra.mxu1 %v3361_v1  ;;  %1481 = vmatprep.subr.bf16.mxu0 %v3366_v2 }
 0x127   :  { %1651 = vmatprep.subr.bf16.mxu1 %v3369_v3  ;;  %v3859_v1 = vshrl.u32 %v328_v63, 7  ;;  %v326_v3 = vld [vmem:[%s3929_s2] sm:$0xf]  ;;  %v3468_v63 = vld [vmem:[#allocation7 + $0x1b4] ss:$8 sps:$4 sm:$0xff]  }
 0x129   :  { %1482 = vmatpush1.bf16.msra.mxu0 %v3364_v4  ;;  %v330_v2 = vsub.s32 0, %v3859_v1  ;;  %v334_v4 = vsub.s32 1, %v3859_v1 }
 0x12a   :  { %1652 = vmatpush1.bf16.msra.mxu1 %v3367_v5  ;;  %1483 = vmatprep.subr.bf16.mxu0 %v3372_v6 }
 0x12b   :  { %1653 = vmatprep.subr.bf16.mxu1 %v3375_v7  ;;  %v331_v5 = vrot.slane %v326_v3, %v330_v2  ;;  %v335_v6 = vrot.slane %v326_v3, %v334_v4 }
 0x12d   :  { %1484 = vmatpush1.bf16.msra.mxu0 %v3370_v8 }
 0x12e   :  { %1654 = vmatpush1.bf16.msra.mxu1 %v3373_v9  ;;  %2119 = vmatprep.subr.bf16.mxu0 %v3387_v10 }
 0x12f   :  { %1655 = vmatprep.subr.bf16.mxu1 %v3381_v11 }
 0x130   :  { %1486 = vmatmul.mubr.bf16.vlgmr.msra.gmra.mrb[0].mxu0 %v3376_v12 }
 0x131   :  { %2120 = vmatpush1.bf16.msra.mxu0 %v3385_v13 }
 0x132   :  { %1656 = vmatpush1.bf16.msra.mxu1 %v3379_v14  ;;  %2121 = vmatprep.subr.bf16.mxu0 %v3390_v15 }
 0x133   :  { %1668 = vmatprep.subr.bf16.mxu1 %v3384_v16 }
 0x135   :  { %1658 = vmatmul.mubr.bf16.vlgmr.msra.gmra.mrb[4].mxu1 %v3376_v12  ;;  %2122 = vmatpush1.bf16.msra.mxu0 %v3388_v17 }
 0x136   :  { %1669 = vmatpush1.bf16.msra.mxu1 %v3382_v18  ;;  %1700 = vmatprep.mubr.bf16.mxu1 %v3692_v0  ;;  %v3408_v0 = vld [vmem:[#allocation7 + $0x74] ss:$8 sps:$4 sm:$0xff]  }
 0x137   :  { %2123 = vmatprep.subr.bf16.mxu0 %v3393_v19  ;;  %2943 = vmatprep.subr.bf16.mxu1 %v3481_v52  ;;  %v3448_v52 = vld [vmem:[#allocation7 + $0x150] ss:$8 sps:$4 sm:$0xff]  }
 0x139   :  { %2124 = vmatpush1.bf16.msra.mxu0 %v3391_v20 }
 0x13a   :  { %2125 = vmatprep.subr.bf16.mxu0 %v3396_v21 }
 0x13d   :  { %2126 = vmatpush1.bf16.msra.mxu0 %v3394_v22 }
 0x13e   :  { %2127 = vmatprep.subr.bf16.mxu0 %v3399_v23 }
 0x141   :  { %2843 = vmatmul.mubr.msk.bf16.vlgmr.msra.gmra.mrb[4].mxu1 %vm1363_vm0, %v3513_v26  ;;  %2128 = vmatpush1.bf16.msra.mxu0 %v3397_v24  ;;  %v338_v26 = vsub.s32 2, %v3859_v1 }
 0x142   :  { %2129 = vmatprep.subr.bf16.mxu0 %v3402_v25  ;;  %2944 = vmatpush3.bf16.msra.mxu1 %v3482_v53  ;;  %v3433_v25 = vld [vmem:[#allocation7 + $0x100] ss:$8 sps:$4 sm:$0xff]   ;;  %v3453_v53 = vld [vmem:[#allocation7 + $0x164] ss:$8 sps:$4 sm:$0xff]  }
 0x143   :  { %2945 = vmatprep.subr.bf16.mxu1 %v3483_v54  ;;  %v3451_v54 = vld [vmem:[#allocation7 + $0x160] ss:$8 sps:$4 sm:$0xff]  }
 0x145   :  { %2130 = vmatpush1.bf16.msra.mxu0 %v3400_v27  ;;  %v3438_v27 = vld [vmem:[#allocation7 + $0x114] ss:$8 sps:$4 sm:$0xff]  }
 0x146   :  { %2131 = vmatprep.subr.bf16.mxu0 %v3405_v28  ;;  %2946 = vmatpush3.bf16.msra.mxu1 %v3484_v55  ;;  %v342_v28 = vsub.s32 3, %v3859_v1  ;;  %v3456_v55 = vld [vmem:[#allocation7 + $0x174] ss:$8 sps:$4 sm:$0xff]   ;;  %v3498_v1 = vld [vmem:[#allocation10 + $0x8] sm:$0xff]  }
 0x147   :  { %2947 = vmatprep.subr.bf16.mxu1 %v3485_v56  ;;  %v3454_v56 = vld [vmem:[#allocation7 + $0x170] ss:$8 sps:$4 sm:$0xff]  }
 0x148   :  { %v3851_v30 = vpop.f32.mrb[0].mxu1 }
 0x149   :  { %v3853_v31 = vpop.f32.mrb[1].mxu1  ;;  %2132 = vmatpush1.bf16.msra.mxu0 %v3403_v29  ;;  %v339_v29 = vrot.slane %v326_v3, %v338_v26 }
 0x14a   :  { %v3855_v33 = vpop.f32.mrb[2].mxu1  ;;  %2133 = vmatprep.subr.bf16.mxu0 %v3408_v0  ;;  %2948 = vmatpush3.bf16.msra.mxu1 %v3486_v57  ;;  %v3436_v0 = vld [vmem:[#allocation7 + $0x110] ss:$8 sps:$4 sm:$0xff]   ;;  %v3459_v57 = vld [vmem:[#allocation7 + $0x184] ss:$8 sps:$4 sm:$0xff]  }
 0x14b   :  { %v3857_v35 = vpop.f32.mrb[3].mxu1  ;;  %2949 = vmatprep.subr.bf16.mxu1 %v3487_v58  ;;  %v3457_v58 = vld [vmem:[#allocation7 + $0x180] ss:$8 sps:$4 sm:$0xff]  }
 0x14d   :  { %2134 = vmatpush1.bf16.msra.mxu0 %v3406_v32 }
 0x14e   :  { %2135 = vmatprep.subr.bf16.mxu0 %v3411_v34  ;;  %2950 = vmatpush3.bf16.msra.mxu1 %v3488_v59  ;;  %v3462_v59 = vld [vmem:[#allocation7 + $0x194] ss:$8 sps:$4 sm:$0xff]  }
 0x14f   :  { %2951 = vmatprep.subr.bf16.mxu1 %v3489_v60  ;;  %v3460_v60 = vld [vmem:[#allocation7 + $0x190] ss:$8 sps:$4 sm:$0xff]  }
 0x151   :  { %2136 = vmatpush1.bf16.msra.mxu0 %v3409_v36 }
 0x152   :  { %2137 = vmatprep.subr.bf16.mxu0 %v3414_v37  ;;  %2952 = vmatpush3.bf16.msra.mxu1 %v3490_v61  ;;  %v3465_v61 = vld [vmem:[#allocation7 + $0x1a4] ss:$8 sps:$4 sm:$0xff]  }
 0x153   :  { %2953 = vmatprep.subr.bf16.mxu1 %v3491_v62  ;;  %v3463_v62 = vld [vmem:[#allocation7 + $0x1a0] ss:$8 sps:$4 sm:$0xff]  }
 0x155   :  { %2138 = vmatpush1.bf16.msra.mxu0 %v3412_v38  ;;  %v3444_v38 = vld [vmem:[#allocation7 + $0x134] ss:$8 sps:$4 sm:$0xff]  }
 0x156   :  { %2139 = vmatprep.subr.bf16.mxu0 %v3417_v39 }
 0x159   :  { %2140 = vmatpush1.bf16.msra.mxu0 %v3415_v40 }
 0x15a   :  { %2141 = vmatprep.subr.bf16.mxu0 %v3420_v41 }
 0x15d   :  { %2142 = vmatpush1.bf16.msra.mxu0 %v3418_v42 }
 0x15e   :  { %2143 = vmatprep.subr.bf16.mxu0 %v3423_v43 }
 0x161   :  { %2144 = vmatpush1.bf16.msra.mxu0 %v3421_v44  ;;  %v3442_v44 = vld [vmem:[#allocation7 + $0x130] ss:$8 sps:$4 sm:$0xff]  }
 0x162   :  { %2145 = vmatprep.subr.bf16.mxu0 %v3426_v45 }
 0x165   :  { %2146 = vmatpush1.bf16.msra.mxu0 %v3424_v46 }
 0x166   :  { %2147 = vmatprep.subr.bf16.mxu0 %v3429_v47  ;;  %v3447_v47 = vld [vmem:[#allocation7 + $0x144] ss:$8 sps:$4 sm:$0xff]  }
 0x169   :  { %2148 = vmatpush1.bf16.msra.mxu0 %v3427_v48 }
 0x16a   :  { %2149 = vmatprep.subr.bf16.mxu0 %v3432_v49 }
 0x16d   :  { %2150 = vmatpush1.bf16.msra.mxu0 %v3430_v50  ;;  %v3445_v50 = vld [vmem:[#allocation7 + $0x140] ss:$8 sps:$4 sm:$0xff]  }
 0x16e   :  { %2162 = vmatprep.subr.bf16.mxu0 %v3435_v51  ;;  %v3450_v51 = vld [vmem:[#allocation7 + $0x154] ss:$8 sps:$4 sm:$0xff]  }
 0x203   :  { %v1487_v7 = vpop.f32.mrb[0].mxu0 }
 0x204   :  { %v3023_v8 = vadd.f32 %v1487_v7, %v331_v5  ;;  %v1489_v9 = vpop.f32.mrb[1].mxu0  ;;  %v3474_v7 = vld [vmem:[#allocation7 + $0x1d4] ss:$8 sps:$4 sm:$0xff]  }
 0x205   :  { %v3025_v10 = vadd.f32 %v1489_v9, %v335_v6  ;;  %v1491_v11 = vpop.f32.mrb[2].mxu0  ;;  %v3477_v9 = vld [vmem:[#allocation7 + $0x1e4] ss:$8 sps:$4 sm:$0xff]  }
 0x206   :  { %v3024_v12 = vadd.f32 %v3023_v8, %v3851_v30  ;;  %v3027_v13 = vadd.f32 %v1491_v11, %v331_v5  ;;  %v1493_v14 = vpop.f32.mrb[3].mxu0  ;;  %v343_v30 = vrot.slane %v326_v3, %v342_v28  ;;  %v3466_v3 = vld [vmem:[#allocation7 + $0x1b0] ss:$8 sps:$4 sm:$0xff]   ;;  %v3471_v5 = vld [vmem:[#allocation7 + $0x1c4] ss:$8 sps:$4 sm:$0xff]  }
 0x207   :  { %v3026_v15 = vadd.f32 %v3025_v10, %v3853_v31  ;;  %v3029_v16 = vadd.f32 %v1493_v14, %v335_v6  ;;  %v3441_v31 = vld [vmem:[#allocation7 + $0x124] ss:$8 sps:$4 sm:$0xff]   ;;  %v3469_v6 = vld [vmem:[#allocation7 + $0x1c0] ss:$8 sps:$4 sm:$0xff]   ;;  %v3472_v8 = vld [vmem:[#allocation7 + $0x1d0] ss:$8 sps:$4 sm:$0xff]  }
 0x208   :  { %v3028_v17 = vadd.f32 %v3027_v13, %v3855_v33  ;;  %v1711_v19 = vmax.f32 %v3024_v12, 0.0  ;;  %v3475_v10 = vld [vmem:[#allocation7 + $0x1e0] ss:$8 sps:$4 sm:$0xff]   ;;  %v3480_v11 = vld [vmem:[#allocation7 + $0x1f4] ss:$8 sps:$4 sm:$0xff]  }
 0x209   :  { %v3030_v18 = vadd.f32 %v3029_v16, %v3857_v35  ;;  %v1712_v21 = vmax.f32 %v3026_v15, 0.0  ;;  %v3439_v35 = vld [vmem:[#allocation7 + $0x120] ss:$8 sps:$4 sm:$0xff]   ;;  %v3478_v12 = vld [vmem:[#allocation7 + $0x1f0] ss:$8 sps:$4 sm:$0xff]  }
 0x20a   :  { %v1715_v20 = vmax.f32 %v3028_v17, 0.0  ;;  %v3492_v13 = vld [vmem:[#allocation8 + $0x28] sm:$0xff]   ;;  %v3493_v14 = vld [vmem:[#allocation8 + $0x70] sm:$0xff]   ;;  %v3495_v16 = vld [vmem:[#allocation8 + $0x78] sm:$0xff]  }
 0x20b   :  { %v1716_v22 = vmax.f32 %v3030_v18, 0.0  ;;  %2954 = vmatpush3.bf16.msra.mxu1 %v3492_v13  ;;  %v3494_v15 = vld [vmem:[#allocation8 + $0x30] sm:$0xff]   ;;  %v3496_v17 = vld [vmem:[#allocation8 + $0x38] sm:$0xff]   ;;  %v3693_v18 = vmov 0.0  }
 0x20c   :  { %v1719_v23 = vpack.c.bf16 %v1715_v20, %v1711_v19  ;;  %2955 = vmatprep.subr.bf16.mxu1 %v3493_v14  ;;  %v1787_v19 = vld [vmem:[%s3931_s4] sm:$0x3] }
 0x20d   :  { %v1720_v24 = vpack.c.bf16 %v1716_v22, %v1712_v21  ;;  %v1792_v20 = vrot.slane %v1787_v19, %v330_v2  ;;  %v1796_v21 = vrot.slane %v1787_v19, %v334_v4  ;;  %v3499_v2 = vld [vmem:[#allocation10 + $0x10] sm:$0xff]   ;;  %v3500_v4 = vld [vmem:[#allocation10 + $0x18] sm:$0xff]  }
 0x20f   :  { %2151 = vmatprep.mubr.bf16.mxu0 %v1720_v24  ;;  %2956 = vmatpush3.bf16.msra.mxu1 %v3494_v15 }
 0x210   :  { %2152 = vmatmul.mubr.bf16.vlgmr.msra.gmra.mrb[4].mxu0 %v1719_v23  ;;  %2957 = vmatprep.subr.bf16.mxu1 %v3495_v16 }
 0x211   :  { %2163 = vmatpush1.bf16.msra.mxu0 %v3433_v25 }
 0x212   :  { %2164 = vmatprep.subr.bf16.mxu0 %v3438_v27 }
 0x213   :  { %2958 = vmatpush3.bf16.msra.mxu1 %v3496_v17 }
 0x214   :  { %v1702_v32 = vpop.f32.mrb[4].mxu1  ;;  %2983 = vmatprep.subr.bf16.mxu1 %v3693_v18 }
 0x215   :  { %v3031_v33 = vadd.f32 %v1702_v32, %v339_v29  ;;  %v1704_v34 = vpop.f32.mrb[5].mxu1  ;;  %2165 = vmatpush1.bf16.msra.mxu0 %v3436_v0 }
 0x216   :  { %v3032_v36 = vadd.f32 %v1704_v34, %v343_v30  ;;  %v1706_v37 = vpop.f32.mrb[6].mxu1  ;;  %2166 = vmatprep.subr.bf16.mxu0 %v3441_v31 }
 0x217   :  { %v3033_v39 = vadd.f32 %v1706_v37, %v339_v29  ;;  %v1708_v40 = vpop.f32.mrb[7].mxu1  ;;  %v1713_v42 = vmax.f32 %v3031_v33, 0.0  ;;  %v3502_v37 = vld [vmem:[#allocation10 + $0x28] sm:$0xff]  }
 0x218   :  { %v3034_v41 = vadd.f32 %v1708_v40, %v343_v30  ;;  %v1714_v45 = vmax.f32 %v3032_v36, 0.0  ;;  %v3501_v36 = vld [vmem:[#allocation10 + $0x20] sm:$0xff]  }
 0x219   :  { %v1717_v43 = vmax.f32 %v3033_v39, 0.0  ;;  %2167 = vmatpush1.bf16.msra.mxu0 %v3439_v35  ;;  %v3497_v35 = vld [vmem:[#allocation10] sm:$0xff]   ;;  %v3504_v39 = vld [vmem:[#allocation10 + $0x38] sm:$0xff]  }
 0x21a   :  { %v1718_v46 = vmax.f32 %v3034_v41, 0.0  ;;  %2168 = vmatprep.subr.bf16.mxu0 %v3444_v38  ;;  %v3503_v38 = vld [vmem:[#allocation10 + $0x30] sm:$0xff]   ;;  %v2908_v41 = vld [vmem:[%s3933_s6] ss:$0 sm:$0xff] }
 0x21b   :  { %v1721_v48 = vpack.c.bf16 %v1717_v43, %v1713_v42 }
 0x21c   :  { %v1722_v49 = vpack.c.bf16 %v1718_v46, %v1714_v45 }
 0x21d   :  { %2169 = vmatpush1.bf16.msra.mxu0 %v3442_v44 }
 0x21e   :  { %2194 = vmatprep.mubr.bf16.mxu0 %v1722_v49  ;;  %2170 = vmatprep.subr.bf16.mxu0 %v3447_v47 }
 0x221   :  { %2171 = vmatpush1.bf16.msra.mxu0 %v3445_v50 }
 0x222   :  { %2172 = vmatprep.subr.bf16.mxu0 %v3450_v51  ;;  %v3505_v51 = vld [vmem:[#allocation11] sm:$0xff]  }
 0x225   :  { %2173 = vmatpush1.bf16.msra.mxu0 %v3448_v52 }
 0x226   :  { %2174 = vmatprep.subr.bf16.mxu0 %v3453_v53  ;;  %v3506_v53 = vld [vmem:[#allocation11 + $0x8] sm:$0xff]  }
 0x229   :  { %2175 = vmatpush1.bf16.msra.mxu0 %v3451_v54  ;;  %v3507_v54 = vld [vmem:[#allocation11 + $0x10] sm:$0xff]  }
 0x22a   :  { %2176 = vmatprep.subr.bf16.mxu0 %v3456_v55  ;;  %v3508_v55 = vld [vmem:[#allocation11 + $0x18] sm:$0xff]  }
 0x22d   :  { %2177 = vmatpush1.bf16.msra.mxu0 %v3454_v56  ;;  %v3509_v56 = vld [vmem:[#allocation11 + $0x20] sm:$0xff]  }
 0x22e   :  { %2178 = vmatprep.subr.bf16.mxu0 %v3459_v57  ;;  %v3510_v57 = vld [vmem:[#allocation11 + $0x28] sm:$0xff]  }
 0x231   :  { %2179 = vmatpush1.bf16.msra.mxu0 %v3457_v58  ;;  %v3511_v58 = vld [vmem:[#allocation11 + $0x30] sm:$0xff]  }
 0x232   :  { %2180 = vmatprep.subr.bf16.mxu0 %v3462_v59  ;;  %v3512_v59 = vld [vmem:[#allocation11 + $0x38] sm:$0xff]  }
 0x235   :  { %2181 = vmatpush1.bf16.msra.mxu0 %v3460_v60  ;;  %v2925_v60 = vld [vmem:[%s3935_s8] ss:$0 sm:$0xff]  ;;  %s3646_s8 = scalar_lea.vmem %s2625_s24, 256 }
 0x236   :  { %2182 = vmatprep.subr.bf16.mxu0 %v3465_v61  ;;  %p3647_p6 = scmp.ne.s32.totalorder %s2625_s24, %s3646_s8  ;;  %p3652_p8 = scmp.lt.s32.totalorder %s3646_s8, %s3646_s8 }
 0x238   :  { %p3653_p9 = por %p3652_p8, %p3651_p7 }
 0x239   :  { %2183 = vmatpush1.bf16.msra.mxu0 %v3463_v62 }
 0x23a   :  { %2184 = vmatprep.subr.bf16.mxu0 %v3468_v63  ;;  %p3654_p10 = pnand %p3653_p9, %p3647_p6 }
 0x23d   :  { %2185 = vmatpush1.bf16.msra.mxu0 %v3466_v3 }
 0x23e   :  { %2186 = vmatprep.subr.bf16.mxu0 %v3471_v5 }
 0x241   :  { %2187 = vmatpush1.bf16.msra.mxu0 %v3469_v6 }
 0x242   :  { %2188 = vmatprep.subr.bf16.mxu0 %v3474_v7 }
 0x245   :  { %2189 = vmatpush1.bf16.msra.mxu0 %v3472_v8 }
 0x246   :  { %2190 = vmatprep.subr.bf16.mxu0 %v3477_v9 }
 0x249   :  { %2191 = vmatpush1.bf16.msra.mxu0 %v3475_v10  ;;  %v2934_v10 = vld [vmem:[%s3937_s10] ss:$0 sm:$0xff] }
 0x24a   :  { %2192 = vmatprep.subr.bf16.mxu0 %v3480_v11 }
 0x24d   :  { %2193 = vmatpush1.bf16.msra.mxu0 %v3478_v12 }
 0x250   :  { %2195 = vmatmul.mubr.bf16.vlgmr.msra.gmra.mrb[4].mxu0 %v1721_v48 }
 0x323   :  { %v2196_v22 = vpop.f32.mrb[4].mxu0 }
 0x324   :  { %v3035_v23 = vadd.f32 %v2196_v22, %v1792_v20  ;;  %v2198_v24 = vpop.f32.mrb[5].mxu0 }
 0x325   :  { %v3036_v25 = vadd.f32 %v2198_v24, %v1796_v21  ;;  %v2200_v26 = vpop.f32.mrb[6].mxu0 }
 0x326   :  { %v3037_v27 = vadd.f32 %v2200_v26, %v1792_v20  ;;  %v2202_v28 = vpop.f32.mrb[7].mxu0  ;;  %v2205_v0 = vmax.f32 %v3035_v23, 0.0 }
 0x327   :  { %v3038_v29 = vadd.f32 %v2202_v28, %v1796_v21  ;;  %v2206_v31 = vmax.f32 %v3036_v25, 0.0 }
 0x328   :  { %v2207_v30 = vmax.f32 %v3037_v27, 0.0 }
 0x329   :  { %v2208_v32 = vmax.f32 %v3038_v29, 0.0 }
 0x32a   :  { %v2209_v33 = vpack.c.bf16 %v2207_v30, %v2205_v0 }
 0x32b   :  { %v2210_v34 = vpack.c.bf16 %v2208_v32, %v2206_v31 }
 0x32d   :  { %2378 = vmatprep.mubr.bf16.mxu1 %v2210_v34 }
 0x32e   :  { %2379 = vmatmul.mubr.bf16.vlgmr.msra.gmra.mrb[8].mxu1 %v2209_v33 }
 0x32f   :  { %2984 = vmatpush3.bf16.msra.mxu1 %v3497_v35  ;;  %2999 = vmatprep.mubr.msk.bf16.mxu1 %vm3694_vm1, %v3693_v18 }
 0x330   :  { %2985 = vmatprep.subr.bf16.mxu1 %v3693_v18 }
 0x333   :  { %2986 = vmatpush3.bf16.msra.mxu1 %v3498_v1 }
 0x334   :  { %2987 = vmatprep.subr.bf16.mxu1 %v3693_v18 }
 0x337   :  { %2988 = vmatpush3.bf16.msra.mxu1 %v3499_v2 }
 0x338   :  { %2989 = vmatprep.subr.bf16.mxu1 %v3693_v18 }
 0x33b   :  { %2990 = vmatpush3.bf16.msra.mxu1 %v3500_v4 }
 0x33c   :  { %2991 = vmatprep.subr.bf16.mxu1 %v3693_v18 }
 0x33f   :  { %2992 = vmatpush3.bf16.msra.mxu1 %v3501_v36 }
 0x340   :  { %2993 = vmatprep.subr.bf16.mxu1 %v3693_v18 }
 0x343   :  { %2994 = vmatpush3.bf16.msra.mxu1 %v3502_v37 }
 0x344   :  { %2995 = vmatprep.subr.bf16.mxu1 %v3693_v18 }
 0x347   :  { %2996 = vmatpush3.bf16.msra.mxu1 %v3503_v38 }
 0x348   :  { %2997 = vmatprep.subr.bf16.mxu1 %v3693_v18 }
 0x34b   :  { %2998 = vmatpush3.bf16.msra.mxu1 %v3504_v39 }
 0x34c   :  { %3003 = vmatprep.subr.bf16.mxu1 %v3693_v18 }
 0x401   :  { %v2959_v40 = vpop.f32.mrb[8].mxu1 }
 0x402   :  { %v2960_v42 = vpop.f32.mrb[9].mxu1 }
 0x403   :  { %v2961_v43 = vadd.f32 %v2960_v42, %v2959_v40  ;;  %v2962_v44 = vpop.f32.mrb[10].mxu1 }
 0x404   :  { %v2963_v45 = vpop.f32.mrb[11].mxu1 }
 0x405   :  { %v2381_v46 = vadd.f32 %v2961_v43, %v2908_v41  ;;  %v2964_v47 = vadd.f32 %v2963_v45, %v2962_v44 }
 0x407   :  { %v2384_v48 = vadd.f32 %v2964_v47, %v2908_v41  ;;  %v2387_v49 = vmax.f32 %v2381_v46, 0.0 }
 0x409   :  { %v2388_v50 = vmax.f32 %v2384_v48, 0.0 }
 0x40b   :  { %v2389_v52 = vpack.c.bf16 %v2388_v50, %v2387_v49 }
 0x40d   :  { %3000 = vmatmul.mubr.bf16.vlgmr.msra.gmra.mrb[12].mxu1 %v2389_v52 }
 0x40e   :  { %3004 = vmatpush3.bf16.msra.mxu1 %v3505_v51  ;;  %3019 = vmatprep.mubr.msk.bf16.mxu1 %vm3694_vm1, %v3693_v18 }
 0x40f   :  { %3005 = vmatprep.subr.bf16.mxu1 %v3693_v18 }
 0x412   :  { %3006 = vmatpush3.bf16.msra.mxu1 %v3506_v53 }
 0x413   :  { %3007 = vmatprep.subr.bf16.mxu1 %v3693_v18 }
 0x416   :  { %3008 = vmatpush3.bf16.msra.mxu1 %v3507_v54 }
 0x417   :  { %3009 = vmatprep.subr.bf16.mxu1 %v3693_v18 }
 0x41a   :  { %3010 = vmatpush3.bf16.msra.mxu1 %v3508_v55 }
 0x41b   :  { %3011 = vmatprep.subr.bf16.mxu1 %v3693_v18 }
 0x41e   :  { %3012 = vmatpush3.bf16.msra.mxu1 %v3509_v56 }
 0x41f   :  { %3013 = vmatprep.subr.bf16.mxu1 %v3693_v18 }
 0x422   :  { %3014 = vmatpush3.bf16.msra.mxu1 %v3510_v57 }
 0x423   :  { %3015 = vmatprep.subr.bf16.mxu1 %v3693_v18 }
 0x426   :  { %3016 = vmatpush3.bf16.msra.mxu1 %v3511_v58 }
 0x427   :  { %3017 = vmatprep.subr.bf16.mxu1 %v3693_v18 }
 0x42a   :  { %3018 = vmatpush3.bf16.msra.mxu1 %v3512_v59 }
 0x4e0   :  { %v2495_v61 = vpop.f32.mrb[12].mxu1 }
 0x4e1   :  { %v2496_v62 = vadd.f32 %v2925_v60, %v2495_v61  ;;  %v3001_v63 = vpop.f32.mrb[13].mxu1 }
 0x4e2   :  { %v2498_v3 = vpop.f32.mrb[14].mxu1 }
 0x4e3   :  { %v2499_v5 = vadd.f32 %v2925_v60, %v2498_v3  ;;  %v3002_v6 = vpop.f32.mrb[15].mxu1  ;;  %v2502_v7 = vmax.f32 %v2496_v62, 0.0 }
 0x4e5   :  { %v2503_v8 = vmax.f32 %v2499_v5, 0.0 }
 0x4e7   :  { %v2504_v9 = vpack.c.bf16 %v2503_v8, %v2502_v7 }
 0x4e9   :  { %3020 = vmatmul.mubr.bf16.vlgmr.msra.gmra.mrb[16].mxu1 %v2504_v9 }
 0x5bc   :  { %v2610_v11 = vpop.f32.mrb[16].mxu1 }
 0x5bd   :  { %v2611_v12 = vadd.f32 %v2934_v10, %v2610_v11  ;;  %v3021_v13 = vpop.f32.mrb[17].mxu1 }
 0x5be   :  { %v2613_v14 = vpop.f32.mrb[18].mxu1 }
 0x5bf   :  { %2617 = vst [vmem:[#allocation13] sm:$0xff] %v2611_v12  ;;  %v2614_v15 = vadd.f32 %v2934_v10, %v2613_v14  ;;  %v3022_v16 = vpop.f32.mrb[19].mxu1 }
 0x5c1   :  { %2618 = vst [vmem:[#allocation13 + $0x8] sm:$0xff] %v2614_v15 }
 0x5c2   :  { %3657 = shalt.err (!%p3654_p10)
}
 0x5c3   :  { %s3658_s3 = scalar_lea.hbm %s3938_s11, 256 }
 0x5c4   :  { %p3659_p11 = scmp.ne.s32.totalorder %s3938_s11, %s3658_s3  ;;  %p3662_p12 = scmp.lt.u32.totalorder %s3658_s3, %s3938_s11 }
 0x5c6   :  { %p3664_p13 = pnand %p3662_p12, %p3659_p11 }
 0x5c8   :  { %3667 = shalt.err (!%p3664_p13)
}
 0x5c9   :  { %2630 = dma.vmem_to_hbm [thread:$0]  %s2625_s24, 256, %s3938_s11, [#allocation4], %s3688_s0, %s3688_s0, %s3689_s26  }
 0x5ca   :  { %3676 = dma.done.wait [#allocation4], 256  }
 0x5cb   :  { %3677 = vsyncadd [#allocation4], 4294967040 }
 0x5cc   :  { %2634 = vsyncpa [#allocation3], 1 }
 0x5cd   :  { %2635 = vsyncpa [#allocation6], 1 }
 0x5ce   :  { %2636 = vsyncpa [#allocation9], 1 }
 0x5cf   :  { %2637 = vsyncpa [#allocation12], 1 }
 0x5d0   :  { %2638 = vsyncpa [#allocation4], 1 }

</bundles_post_ra>
